<compile_context>
chip_gen: v6e
topology: v6e:2x2x1
jax: 0.10.0
libtpu: 0.0.40
codegen_flags: <defaults>
</compile_context>

<pallas_src>
import functools

import jax
import jax.numpy as jnp
from jax.experimental import pallas as pl
from jax.experimental.pallas import tpu as pltpu


# ------------------- fused branch kernel: pool + MLP(BN,ELU)x2 -------------------

def _bn_elu(x, gamma, beta, eps=1e-5):
    # nn.BatchNorm1d training-mode forward (biased batch stats) followed by ELU.
    mean = jnp.mean(x, axis=0, keepdims=True)
    var = jnp.mean(jnp.square(x - mean), axis=0, keepdims=True)
    y = gamma * (x - mean) * jax.lax.rsqrt(var + eps) + beta
    return jnp.where(y > 0.0, y, jnp.exp(jnp.minimum(y, 0.0)) - 1.0)


def _branch_kernel(bidx_ref, m1_ref, m2_ref, gw_ref,
                   w11_ref, w12_ref, w21_ref, w22_ref,
                   vec1_ref, vec2_ref, k1_ref, k2_ref):
    G = k1_ref.shape[0]
    N = m1_ref.shape[0]

    # one-hot segment mask (G, N) built on the fly from graph.batch (int32)
    mask = (bidx_ref[...] ==
            jax.lax.broadcasted_iota(jnp.int32, (G, N), 0)).astype(jnp.float32)

    v1 = vec1_ref[...]          # (6, 2H):  [L1 bias, bn1 gamma, bn1 beta] x 2
    v2 = vec2_ref[...]          # (6, 32H): [L2 bias, bn2 gamma, bn2 beta] x 2

    def pool(m, gw_row):
        # gate scores (1, N) = gw_row (1,H) . m^T   (gate bias omitted: it is a
        # constant shift per node set and cancels in the per-graph softmax).
        gate = jax.lax.dot_general(gw_row, m, (((1,), (1,)), ((), ())),
                                   preferred_element_type=jnp.float32)
        logits = jnp.where(mask > 0.0, gate, jnp.float32(-1e30))
        mx = jnp.max(logits, axis=-1, keepdims=True)
        p = jnp.exp(logits - mx) * mask
        denom = jnp.maximum(jnp.sum(p, axis=-1, keepdims=True), jnp.float32(1e-30))
        return jnp.dot(p / denom, m, preferred_element_type=jnp.float32)   # (G, H)

    def mlp(x, w1, w2, vv1, vv2):
        h1 = jnp.dot(x, w1, preferred_element_type=jnp.float32) + vv1[0:1, :]
        h1 = _bn_elu(h1, vv1[1:2, :], vv1[2:3, :])
        h2 = jnp.dot(h1, w2, preferred_element_type=jnp.float32) + vv2[0:1, :]
        return _bn_elu(h2, vv2[1:2, :], vv2[2:3, :])

    m1 = m1_ref[...]
    m2 = m2_ref[...]
    k1_ref[...] = mlp(pool(m1, gw_ref[0:1, :]), w11_ref[...], w21_ref[...],
                      v1[0:3, :], v2[0:3, :]).astype(k1_ref.dtype)
    k2_ref[...] = mlp(pool(m2, gw_ref[1:2, :]), w12_ref[...], w22_ref[...],
                      v1[3:6, :], v2[3:6, :]).astype(k2_ref.dtype)


def pallas_branch_pool_mlp(bidx2d, M1, M2, gate_w, W1_1, W1_2, W2_1, W2_2,
                           vec1, vec2, num_graphs):
    H2 = W2_1.shape[1]                 # 32 * h_dim
    out_shape = (jax.ShapeDtypeStruct((num_graphs, H2), jnp.float32),
                 jax.ShapeDtypeStruct((num_graphs, H2), jnp.float32))
    # Single invocation: every ref is a whole-array VMEM block (always legal).
    return pl.pallas_call(
        _branch_kernel,
        out_shape=out_shape,
        compiler_params=pltpu.CompilerParams(
            vmem_limit_bytes=48 * 1024 * 1024),
    )(bidx2d, M1, M2, gate_w, W1_1, W1_2, W2_1, W2_2, vec1, vec2)


# --------------------- fused combine (M1*a1 + M2*a2) @ W + b ---------------------

def _combine_linear_kernel(m1_ref, m2_ref, att_ref, w_ref, b_ref, o_ref):
    # Narrow att strips + incremental accumulate keep the live vreg set small.
    end = m1_ref[...] * att_ref[:, 0:1]
    end = end + m2_ref[...] * att_ref[:, 1:2]
    o_ref[...] = (jnp.dot(end, w_ref[...], preferred_element_type=jnp.float32)
                  + b_ref[...]).astype(o_ref.dtype)


def pallas_combine_linear(M1, M2, att, w, b2d, tile_n=1024):
    N, H = M1.shape
    Hout = w.shape[1]
    # No HBM pad/slice copies: N <= tile_n -> one full-extent block;
    # otherwise an 8-divisible tile whose ragged last block Pallas masks.
    tile = N if N <= tile_n else tile_n
    grid = (pl.cdiv(N, tile),)
    # TODO(synk): cast M1/M2/w to bf16 (keeping f32 accumulation) once relaxed
    #             numerics vs the f32 reference are acceptable.
    return pl.pallas_call(
        _combine_linear_kernel,
        out_shape=jax.ShapeDtypeStruct((N, Hout), jnp.float32),
        grid=grid,
        in_specs=[
            pl.BlockSpec((tile, H), lambda i: (i, 0)),
            pl.BlockSpec((tile, H), lambda i: (i, 0)),
            pl.BlockSpec((tile, 2), lambda i: (i, 0)),
            pl.BlockSpec((H, Hout), lambda i: (0, 0)),
            pl.BlockSpec((1, Hout), lambda i: (0, 0)),
        ],
        out_specs=pl.BlockSpec((tile, Hout), lambda i: (i, 0)),
        compiler_params=pltpu.CompilerParams(
            dimension_semantics=("parallel",),
            vmem_limit_bytes=32 * 1024 * 1024),
    )(M1, M2, att, w, b2d)


# ----------------------------------- params --------------------------------------

def init_params(key, h_dim, heads, batch=32):
    ks = jax.random.split(key, 8)

    def lin_w(k, fan_in, fan_out):
        return jax.random.normal(k, (fan_in, fan_out), jnp.float32) / jnp.sqrt(
            jnp.float32(fan_in))

    p = {}
    # gate_nn Linear(h_dim, 1) per branch; bias dropped (cancels in the softmax).
    g1 = lin_w(ks[0], h_dim, 1)
    g2 = lin_w(ks[1], h_dim, 1)
    p["gate_w"] = jnp.concatenate([g1.T, g2.T], axis=0)                 # (2, H)

    # MLP(h_dim, 2*h_dim, batch*h_dim) x 2
    p["mlp1_w1"] = lin_w(ks[2], h_dim, 2 * h_dim)
    p["mlp1_w2"] = lin_w(ks[3], 2 * h_dim, batch * h_dim)
    p["mlp2_w1"] = lin_w(ks[4], h_dim, 2 * h_dim)
    p["mlp2_w2"] = lin_w(ks[5], 2 * h_dim, batch * h_dim)

    def pack(dim):
        b = jnp.zeros((1, dim), jnp.float32)      # Linear bias
        g = jnp.ones((1, dim), jnp.float32)       # BN gamma
        be = jnp.zeros((1, dim), jnp.float32)     # BN beta
        return jnp.concatenate([b, g, be], axis=0)

    # rows: [L bias, BN gamma, BN beta] for branch 1 then branch 2
    p["vec1"] = jnp.concatenate([pack(2 * h_dim), pack(2 * h_dim)], axis=0)
    p["vec2"] = jnp.concatenate([pack(batch * h_dim), pack(batch * h_dim)], 0)

    # w_q : xavier-normal [1, h_dim]
    p["w_q"] = jax.random.normal(ks[6], (1, h_dim), jnp.float32) * jnp.sqrt(
        2.0 / (1 + h_dim))
    p["lin_w"] = lin_w(ks[7], h_dim, heads * h_dim)
    p["lin_b"] = jnp.zeros((heads * h_dim,), jnp.float32)
    return p


# ----------------------------------- forward -------------------------------------

@functools.partial(jax.jit, static_argnames=("h_dim", "heads", "num_graphs"))
def attpooling_forward(params, batch_idx, M1, M2, h_dim, heads, num_graphs):
    bidx2d = batch_idx.reshape(1, -1).astype(jnp.int32)                 # (1, N)

    k1, k2 = pallas_branch_pool_mlp(
        bidx2d, M1, M2, params["gate_w"],
        params["mlp1_w1"], params["mlp2_w1"],
        params["mlp1_w2"], params["mlp2_w2"],
        params["vec1"], params["vec2"], num_graphs)                     # (G, 32H) x2

    # view(-1, h_dim), w_q scores, 2-way softmax, gather onto nodes (tiny XLA glue,
    # semantics identical to the PyTorch reference's att[graph.batch] indexing).
    k1 = k1.reshape(-1, h_dim)                                          # (G*32, H)
    k2 = k2.reshape(-1, h_dim)
    s1 = jnp.sum(params["w_q"] * k1, axis=-1, keepdims=True)
    s2 = jnp.sum(params["w_q"] * k2, axis=-1, keepdims=True)
    att = jax.nn.softmax(jnp.concatenate([s1, s2], axis=-1), axis=-1)   # (G*32, 2)
    att_nodes = att[batch_idx]                                          # (N, 2)

    out = pallas_combine_linear(M1, M2, att_nodes, params["lin_w"],
                                params["lin_b"].reshape(1, -1))         # (N, heads*h)
    return out.reshape(-1, heads, h_dim)


# ------------------------------------- main ---------------------------------------

if __name__ == "__main__":
    key = jax.random.PRNGKey(0)
    h_dim, heads = 32, 2
    num_graphs = 2
    nodes_per_graph = [5, 7]
    N = sum(nodes_per_graph)                               # 12 nodes total
    batch_idx = jnp.array([0] * 5 + [1] * 7, jnp.int32)    # graph.batch
    # graph.ptr would be [0, 5, 12]; it is equivalent to batch_idx here.

    kM1, kM2, kP = jax.random.split(key, 3)
    M1 = jax.random.normal(kM1, (N, h_dim), jnp.float32)
    M2 = jax.random.normal(kM2, (N, h_dim), jnp.float32)
    params = init_params(kP, h_dim, heads)

    out = attpooling_forward(params, batch_idx, M1, M2,
                             h_dim=h_dim, heads=heads, num_graphs=num_graphs)
    out = jax.block_until_ready(out)
    assert out.shape == (N, heads, h_dim)
    assert bool(jnp.all(jnp.isfinite(out)))
    print("KERNEL_OK")
</pallas_src>

<mosaic_0001>
module attributes {stable_mosaic.version = 11 : i64} {
  func.func @_branch_kernel(%arg0: memref<1x12xi32, #tpu.memory_space<vmem>>, %arg1: memref<12x32xf32, #tpu.memory_space<vmem>>, %arg2: memref<12x32xf32, #tpu.memory_space<vmem>>, %arg3: memref<2x32xf32, #tpu.memory_space<vmem>>, %arg4: memref<32x64xf32, #tpu.memory_space<vmem>>, %arg5: memref<32x64xf32, #tpu.memory_space<vmem>>, %arg6: memref<64x1024xf32, #tpu.memory_space<vmem>>, %arg7: memref<64x1024xf32, #tpu.memory_space<vmem>>, %arg8: memref<6x64xf32, #tpu.memory_space<vmem>>, %arg9: memref<6x1024xf32, #tpu.memory_space<vmem>>, %arg10: memref<2x1024xf32, #tpu.memory_space<vmem>>, %arg11: memref<2x1024xf32, #tpu.memory_space<vmem>>) attributes {dimension_semantics = [], scalar_prefetch = 0 : i64, scratch_operands = 0 : i64, tpu.core_type = #tpu.core_type<tc>} {
    %c0 = arith.constant 0 : index
    %c0_0 = arith.constant 0 : index
    %0 = vector.load %arg0[%c0, %c0_0] : memref<1x12xi32, #tpu.memory_space<vmem>>, vector<1x12xi32>
    %1 = tpu.iota {dimensions = array<i32: 0>} : vector<2x12xi32>
    %2 = vector.broadcast %0 : vector<1x12xi32> to vector<2x12xi32>
    %3 = arith.cmpi eq, %2, %1 : vector<2x12xi32>
    %4 = arith.extui %3 : vector<2x12xi1> to vector<2x12xi32>
    %5 = arith.sitofp %4 : vector<2x12xi32> to vector<2x12xf32>
    %c0_1 = arith.constant 0 : index
    %c0_2 = arith.constant 0 : index
    %6 = vector.load %arg8[%c0_1, %c0_2] : memref<6x64xf32, #tpu.memory_space<vmem>>, vector<6x64xf32>
    %c0_3 = arith.constant 0 : index
    %c0_4 = arith.constant 0 : index
    %7 = vector.load %arg9[%c0_3, %c0_4] : memref<6x1024xf32, #tpu.memory_space<vmem>>, vector<6x1024xf32>
    %c0_5 = arith.constant 0 : index
    %c0_6 = arith.constant 0 : index
    %8 = vector.load %arg1[%c0_5, %c0_6] : memref<12x32xf32, #tpu.memory_space<vmem>>, vector<12x32xf32>
    %c0_7 = arith.constant 0 : index
    %c0_8 = arith.constant 0 : index
    %9 = vector.load %arg2[%c0_7, %c0_8] : memref<12x32xf32, #tpu.memory_space<vmem>>, vector<12x32xf32>
    %c0_9 = arith.constant 0 : index
    %c0_10 = arith.constant 0 : index
    %10 = vector.load %arg3[%c0_9, %c0_10] : memref<2x32xf32, #tpu.memory_space<vmem>>, vector<1x32xf32>
    %cst = arith.constant dense<0.000000e+00> : vector<1x12xf32>
    %11 = tpu.matmul %10, %8, %cst {dimension_numbers = #tpu.dot_dimension_numbers<[1], [1], [0], [0], [0, 0, 1, 0], [], []>} : vector<1x32xf32>, vector<12x32xf32>, vector<1x12xf32> -> vector<1x12xf32>
    %cst_11 = arith.constant 0.000000e+00 : f32
    %12 = vector.broadcast %cst_11 : f32 to vector<2x12xf32>
    %13 = arith.cmpf ogt, %5, %12 : vector<2x12xf32>
    %cst_12 = arith.constant -1.000000e+30 : f32
    %14 = vector.shape_cast %11 : vector<1x12xf32> to vector<1x12xf32>
    %15 = vector.broadcast %14 : vector<1x12xf32> to vector<2x12xf32>
    %16 = vector.broadcast %cst_12 : f32 to vector<2x12xf32>
    %17 = arith.select %13, %15, %16 : vector<2x12xi1>, vector<2x12xf32>
    %cst_13 = arith.constant dense<0xFF800000> : vector<2xf32>
    %18 = vector.multi_reduction <maximumf>, %17, %cst_13 [1] : vector<2x12xf32> to vector<2xf32>
    %19 = vector.shape_cast %18 : vector<2xf32> to vector<2x1xf32>
    %20 = vector.broadcast %19 : vector<2x1xf32> to vector<2x12xf32>
    %21 = arith.subf %17, %20 : vector<2x12xf32>
    %22 = math.exp %21 : vector<2x12xf32>
    %23 = arith.mulf %22, %5 : vector<2x12xf32>
    %cst_14 = arith.constant dense<0.000000e+00> : vector<2xf32>
    %24 = vector.multi_reduction <add>, %23, %cst_14 [1] : vector<2x12xf32> to vector<2xf32>
    %25 = vector.shape_cast %24 : vector<2xf32> to vector<2x1xf32>
    %cst_15 = arith.constant 1.000000e-30 : f32
    %26 = vector.broadcast %cst_15 : f32 to vector<2x1xf32>
    %27 = arith.maximumf %25, %26 : vector<2x1xf32>
    %28 = vector.broadcast %27 : vector<2x1xf32> to vector<2x12xf32>
    %29 = arith.divf %23, %28 : vector<2x12xf32>
    %cst_16 = arith.constant dense<0.000000e+00> : vector<2x32xf32>
    %30 = tpu.matmul %29, %8, %cst_16 {dimension_numbers = #tpu.dot_dimension_numbers<[1], [0], [0], [1], [0, 0, 1, 1], [], []>} : vector<2x12xf32>, vector<12x32xf32>, vector<2x32xf32> -> vector<2x32xf32>
    %c0_17 = arith.constant 0 : index
    %c0_18 = arith.constant 0 : index
    %31 = vector.load %arg4[%c0_17, %c0_18] : memref<32x64xf32, #tpu.memory_space<vmem>>, vector<32x64xf32>
    %c0_19 = arith.constant 0 : index
    %c0_20 = arith.constant 0 : index
    %32 = vector.load %arg6[%c0_19, %c0_20] : memref<64x1024xf32, #tpu.memory_space<vmem>>, vector<64x1024xf32>
    %33 = vector.extract_strided_slice %6 {offsets = [0, 0], sizes = [3, 64], strides = [1, 1]} : vector<6x64xf32> to vector<3x64xf32>
    %34 = vector.extract_strided_slice %7 {offsets = [0, 0], sizes = [3, 1024], strides = [1, 1]} : vector<6x1024xf32> to vector<3x1024xf32>
    %cst_21 = arith.constant dense<0.000000e+00> : vector<2x64xf32>
    %35 = tpu.matmul %30, %31, %cst_21 {dimension_numbers = #tpu.dot_dimension_numbers<[1], [0], [0], [1], [0, 0, 1, 1], [], []>} : vector<2x32xf32>, vector<32x64xf32>, vector<2x64xf32> -> vector<2x64xf32>
    %36 = vector.extract_strided_slice %33 {offsets = [0, 0], sizes = [1, 64], strides = [1, 1]} : vector<3x64xf32> to vector<1x64xf32>
    %37 = vector.broadcast %36 : vector<1x64xf32> to vector<2x64xf32>
    %38 = arith.addf %35, %37 : vector<2x64xf32>
    %39 = vector.extract_strided_slice %33 {offsets = [1, 0], sizes = [1, 64], strides = [1, 1]} : vector<3x64xf32> to vector<1x64xf32>
    %40 = vector.extract_strided_slice %33 {offsets = [2, 0], sizes = [1, 64], strides = [1, 1]} : vector<3x64xf32> to vector<1x64xf32>
    %cst_22 = arith.constant dense<0.000000e+00> : vector<64xf32>
    %41 = vector.multi_reduction <add>, %38, %cst_22 [0] : vector<2x64xf32> to vector<64xf32>
    %42 = vector.shape_cast %41 : vector<64xf32> to vector<1x64xf32>
    %cst_23 = arith.constant 2.000000e+00 : f32
    %43 = vector.broadcast %cst_23 : f32 to vector<1x64xf32>
    %44 = arith.divf %42, %43 : vector<1x64xf32>
    %45 = vector.broadcast %44 : vector<1x64xf32> to vector<2x64xf32>
    %46 = arith.subf %38, %45 : vector<2x64xf32>
    %47 = arith.mulf %46, %46 : vector<2x64xf32>
    %cst_24 = arith.constant dense<0.000000e+00> : vector<64xf32>
    %48 = vector.multi_reduction <add>, %47, %cst_24 [0] : vector<2x64xf32> to vector<64xf32>
    %49 = vector.shape_cast %48 : vector<64xf32> to vector<1x64xf32>
    %cst_25 = arith.constant 2.000000e+00 : f32
    %50 = vector.broadcast %cst_25 : f32 to vector<1x64xf32>
    %51 = arith.divf %49, %50 : vector<1x64xf32>
    %52 = vector.broadcast %44 : vector<1x64xf32> to vector<2x64xf32>
    %53 = arith.subf %38, %52 : vector<2x64xf32>
    %54 = vector.broadcast %39 : vector<1x64xf32> to vector<2x64xf32>
    %55 = arith.mulf %54, %53 : vector<2x64xf32>
    %cst_26 = arith.constant 9.99999974E-6 : f32
    %56 = vector.broadcast %cst_26 : f32 to vector<1x64xf32>
    %57 = arith.addf %51, %56 : vector<1x64xf32>
    %58 = math.rsqrt %57 : vector<1x64xf32>
    %59 = vector.broadcast %58 : vector<1x64xf32> to vector<2x64xf32>
    %60 = arith.mulf %55, %59 : vector<2x64xf32>
    %61 = vector.broadcast %40 : vector<1x64xf32> to vector<2x64xf32>
    %62 = arith.addf %60, %61 : vector<2x64xf32>
    %cst_27 = arith.constant 0.000000e+00 : f32
    %63 = vector.broadcast %cst_27 : f32 to vector<2x64xf32>
    %64 = arith.cmpf ogt, %62, %63 : vector<2x64xf32>
    %cst_28 = arith.constant 0.000000e+00 : f32
    %65 = vector.broadcast %cst_28 : f32 to vector<2x64xf32>
    %66 = arith.minimumf %62, %65 : vector<2x64xf32>
    %67 = math.exp %66 : vector<2x64xf32>
    %cst_29 = arith.constant 1.000000e+00 : f32
    %68 = vector.broadcast %cst_29 : f32 to vector<2x64xf32>
    %69 = arith.subf %67, %68 : vector<2x64xf32>
    %70 = arith.select %64, %62, %69 : vector<2x64xi1>, vector<2x64xf32>
    %cst_30 = arith.constant dense<0.000000e+00> : vector<2x1024xf32>
    %71 = tpu.matmul %70, %32, %cst_30 {dimension_numbers = #tpu.dot_dimension_numbers<[1], [0], [0], [1], [0, 0, 1, 1], [], []>} : vector<2x64xf32>, vector<64x1024xf32>, vector<2x1024xf32> -> vector<2x1024xf32>
    %72 = vector.extract_strided_slice %34 {offsets = [0, 0], sizes = [1, 1024], strides = [1, 1]} : vector<3x1024xf32> to vector<1x1024xf32>
    %73 = vector.broadcast %72 : vector<1x1024xf32> to vector<2x1024xf32>
    %74 = arith.addf %71, %73 : vector<2x1024xf32>
    %75 = vector.extract_strided_slice %34 {offsets = [1, 0], sizes = [1, 1024], strides = [1, 1]} : vector<3x1024xf32> to vector<1x1024xf32>
    %76 = vector.extract_strided_slice %34 {offsets = [2, 0], sizes = [1, 1024], strides = [1, 1]} : vector<3x1024xf32> to vector<1x1024xf32>
    %cst_31 = arith.constant dense<0.000000e+00> : vector<1024xf32>
    %77 = vector.multi_reduction <add>, %74, %cst_31 [0] : vector<2x1024xf32> to vector<1024xf32>
    %78 = vector.shape_cast %77 : vector<1024xf32> to vector<1x1024xf32>
    %cst_32 = arith.constant 2.000000e+00 : f32
    %79 = vector.broadcast %cst_32 : f32 to vector<1x1024xf32>
    %80 = arith.divf %78, %79 : vector<1x1024xf32>
    %81 = vector.broadcast %80 : vector<1x1024xf32> to vector<2x1024xf32>
    %82 = arith.subf %74, %81 : vector<2x1024xf32>
    %83 = arith.mulf %82, %82 : vector<2x1024xf32>
    %cst_33 = arith.constant dense<0.000000e+00> : vector<1024xf32>
    %84 = vector.multi_reduction <add>, %83, %cst_33 [0] : vector<2x1024xf32> to vector<1024xf32>
    %85 = vector.shape_cast %84 : vector<1024xf32> to vector<1x1024xf32>
    %cst_34 = arith.constant 2.000000e+00 : f32
    %86 = vector.broadcast %cst_34 : f32 to vector<1x1024xf32>
    %87 = arith.divf %85, %86 : vector<1x1024xf32>
    %88 = vector.broadcast %80 : vector<1x1024xf32> to vector<2x1024xf32>
    %89 = arith.subf %74, %88 : vector<2x1024xf32>
    %90 = vector.broadcast %75 : vector<1x1024xf32> to vector<2x1024xf32>
    %91 = arith.mulf %90, %89 : vector<2x1024xf32>
    %cst_35 = arith.constant 9.99999974E-6 : f32
    %92 = vector.broadcast %cst_35 : f32 to vector<1x1024xf32>
    %93 = arith.addf %87, %92 : vector<1x1024xf32>
    %94 = math.rsqrt %93 : vector<1x1024xf32>
    %95 = vector.broadcast %94 : vector<1x1024xf32> to vector<2x1024xf32>
    %96 = arith.mulf %91, %95 : vector<2x1024xf32>
    %97 = vector.broadcast %76 : vector<1x1024xf32> to vector<2x1024xf32>
    %98 = arith.addf %96, %97 : vector<2x1024xf32>
    %cst_36 = arith.constant 0.000000e+00 : f32
    %99 = vector.broadcast %cst_36 : f32 to vector<2x1024xf32>
    %100 = arith.cmpf ogt, %98, %99 : vector<2x1024xf32>
    %cst_37 = arith.constant 0.000000e+00 : f32
    %101 = vector.broadcast %cst_37 : f32 to vector<2x1024xf32>
    %102 = arith.minimumf %98, %101 : vector<2x1024xf32>
    %103 = math.exp %102 : vector<2x1024xf32>
    %cst_38 = arith.constant 1.000000e+00 : f32
    %104 = vector.broadcast %cst_38 : f32 to vector<2x1024xf32>
    %105 = arith.subf %103, %104 : vector<2x1024xf32>
    %106 = arith.select %100, %98, %105 : vector<2x1024xi1>, vector<2x1024xf32>
    %c0_39 = arith.constant 0 : index
    %c0_40 = arith.constant 0 : index
    %107 = vector.load %arg10[%c0_39, %c0_40] : memref<2x1024xf32, #tpu.memory_space<vmem>>, vector<2x1024xf32>
    tpu.vector_store %arg10[%c0_39, %c0_40], %106 {strides = array<i32>} : memref<2x1024xf32, #tpu.memory_space<vmem>>, vector<2x1024xf32>,
    %c1 = arith.constant 1 : index
    %c0_41 = arith.constant 0 : index
    %108 = vector.load %arg3[%c1, %c0_41] : memref<2x32xf32, #tpu.memory_space<vmem>>, vector<1x32xf32>
    %cst_42 = arith.constant dense<0.000000e+00> : vector<1x12xf32>
    %109 = tpu.matmul %108, %9, %cst_42 {dimension_numbers = #tpu.dot_dimension_numbers<[1], [1], [0], [0], [0, 0, 1, 0], [], []>} : vector<1x32xf32>, vector<12x32xf32>, vector<1x12xf32> -> vector<1x12xf32>
    %cst_43 = arith.constant 0.000000e+00 : f32
    %110 = vector.broadcast %cst_43 : f32 to vector<2x12xf32>
    %111 = arith.cmpf ogt, %5, %110 : vector<2x12xf32>
    %cst_44 = arith.constant -1.000000e+30 : f32
    %112 = vector.shape_cast %109 : vector<1x12xf32> to vector<1x12xf32>
    %113 = vector.broadcast %112 : vector<1x12xf32> to vector<2x12xf32>
    %114 = vector.broadcast %cst_44 : f32 to vector<2x12xf32>
    %115 = arith.select %111, %113, %114 : vector<2x12xi1>, vector<2x12xf32>
    %cst_45 = arith.constant dense<0xFF800000> : vector<2xf32>
    %116 = vector.multi_reduction <maximumf>, %115, %cst_45 [1] : vector<2x12xf32> to vector<2xf32>
    %117 = vector.shape_cast %116 : vector<2xf32> to vector<2x1xf32>
    %118 = vector.broadcast %117 : vector<2x1xf32> to vector<2x12xf32>
    %119 = arith.subf %115, %118 : vector<2x12xf32>
    %120 = math.exp %119 : vector<2x12xf32>
    %121 = arith.mulf %120, %5 : vector<2x12xf32>
    %cst_46 = arith.constant dense<0.000000e+00> : vector<2xf32>
    %122 = vector.multi_reduction <add>, %121, %cst_46 [1] : vector<2x12xf32> to vector<2xf32>
    %123 = vector.shape_cast %122 : vector<2xf32> to vector<2x1xf32>
    %cst_47 = arith.constant 1.000000e-30 : f32
    %124 = vector.broadcast %cst_47 : f32 to vector<2x1xf32>
    %125 = arith.maximumf %123, %124 : vector<2x1xf32>
    %126 = vector.broadcast %125 : vector<2x1xf32> to vector<2x12xf32>
    %127 = arith.divf %121, %126 : vector<2x12xf32>
    %cst_48 = arith.constant dense<0.000000e+00> : vector<2x32xf32>
    %128 = tpu.matmul %127, %9, %cst_48 {dimension_numbers = #tpu.dot_dimension_numbers<[1], [0], [0], [1], [0, 0, 1, 1], [], []>} : vector<2x12xf32>, vector<12x32xf32>, vector<2x32xf32> -> vector<2x32xf32>
    %c0_49 = arith.constant 0 : index
    %c0_50 = arith.constant 0 : index
    %129 = vector.load %arg5[%c0_49, %c0_50] : memref<32x64xf32, #tpu.memory_space<vmem>>, vector<32x64xf32>
    %c0_51 = arith.constant 0 : index
    %c0_52 = arith.constant 0 : index
    %130 = vector.load %arg7[%c0_51, %c0_52] : memref<64x1024xf32, #tpu.memory_space<vmem>>, vector<64x1024xf32>
    %131 = vector.extract_strided_slice %6 {offsets = [3, 0], sizes = [3, 64], strides = [1, 1]} : vector<6x64xf32> to vector<3x64xf32>
    %132 = vector.extract_strided_slice %7 {offsets = [3, 0], sizes = [3, 1024], strides = [1, 1]} : vector<6x1024xf32> to vector<3x1024xf32>
    %cst_53 = arith.constant dense<0.000000e+00> : vector<2x64xf32>
    %133 = tpu.matmul %128, %129, %cst_53 {dimension_numbers = #tpu.dot_dimension_numbers<[1], [0], [0], [1], [0, 0, 1, 1], [], []>} : vector<2x32xf32>, vector<32x64xf32>, vector<2x64xf32> -> vector<2x64xf32>
    %134 = vector.extract_strided_slice %131 {offsets = [0, 0], sizes = [1, 64], strides = [1, 1]} : vector<3x64xf32> to vector<1x64xf32>
    %135 = vector.broadcast %134 : vector<1x64xf32> to vector<2x64xf32>
    %136 = arith.addf %133, %135 : vector<2x64xf32>
    %137 = vector.extract_strided_slice %131 {offsets = [1, 0], sizes = [1, 64], strides = [1, 1]} : vector<3x64xf32> to vector<1x64xf32>
    %138 = vector.extract_strided_slice %131 {offsets = [2, 0], sizes = [1, 64], strides = [1, 1]} : vector<3x64xf32> to vector<1x64xf32>
    %cst_54 = arith.constant dense<0.000000e+00> : vector<64xf32>
    %139 = vector.multi_reduction <add>, %136, %cst_54 [0] : vector<2x64xf32> to vector<64xf32>
    %140 = vector.shape_cast %139 : vector<64xf32> to vector<1x64xf32>
    %cst_55 = arith.constant 2.000000e+00 : f32
    %141 = vector.broadcast %cst_55 : f32 to vector<1x64xf32>
    %142 = arith.divf %140, %141 : vector<1x64xf32>
    %143 = vector.broadcast %142 : vector<1x64xf32> to vector<2x64xf32>
    %144 = arith.subf %136, %143 : vector<2x64xf32>
    %145 = arith.mulf %144, %144 : vector<2x64xf32>
    %cst_56 = arith.constant dense<0.000000e+00> : vector<64xf32>
    %146 = vector.multi_reduction <add>, %145, %cst_56 [0] : vector<2x64xf32> to vector<64xf32>
    %147 = vector.shape_cast %146 : vector<64xf32> to vector<1x64xf32>
    %cst_57 = arith.constant 2.000000e+00 : f32
    %148 = vector.broadcast %cst_57 : f32 to vector<1x64xf32>
    %149 = arith.divf %147, %148 : vector<1x64xf32>
    %150 = vector.broadcast %142 : vector<1x64xf32> to vector<2x64xf32>
    %151 = arith.subf %136, %150 : vector<2x64xf32>
    %152 = vector.broadcast %137 : vector<1x64xf32> to vector<2x64xf32>
    %153 = arith.mulf %152, %151 : vector<2x64xf32>
    %cst_58 = arith.constant 9.99999974E-6 : f32
    %154 = vector.broadcast %cst_58 : f32 to vector<1x64xf32>
    %155 = arith.addf %149, %154 : vector<1x64xf32>
    %156 = math.rsqrt %155 : vector<1x64xf32>
    %157 = vector.broadcast %156 : vector<1x64xf32> to vector<2x64xf32>
    %158 = arith.mulf %153, %157 : vector<2x64xf32>
    %159 = vector.broadcast %138 : vector<1x64xf32> to vector<2x64xf32>
    %160 = arith.addf %158, %159 : vector<2x64xf32>
    %cst_59 = arith.constant 0.000000e+00 : f32
    %161 = vector.broadcast %cst_59 : f32 to vector<2x64xf32>
    %162 = arith.cmpf ogt, %160, %161 : vector<2x64xf32>
    %cst_60 = arith.constant 0.000000e+00 : f32
    %163 = vector.broadcast %cst_60 : f32 to vector<2x64xf32>
    %164 = arith.minimumf %160, %163 : vector<2x64xf32>
    %165 = math.exp %164 : vector<2x64xf32>
    %cst_61 = arith.constant 1.000000e+00 : f32
    %166 = vector.broadcast %cst_61 : f32 to vector<2x64xf32>
    %167 = arith.subf %165, %166 : vector<2x64xf32>
    %168 = arith.select %162, %160, %167 : vector<2x64xi1>, vector<2x64xf32>
    %cst_62 = arith.constant dense<0.000000e+00> : vector<2x1024xf32>
    %169 = tpu.matmul %168, %130, %cst_62 {dimension_numbers = #tpu.dot_dimension_numbers<[1], [0], [0], [1], [0, 0, 1, 1], [], []>} : vector<2x64xf32>, vector<64x1024xf32>, vector<2x1024xf32> -> vector<2x1024xf32>
    %170 = vector.extract_strided_slice %132 {offsets = [0, 0], sizes = [1, 1024], strides = [1, 1]} : vector<3x1024xf32> to vector<1x1024xf32>
    %171 = vector.broadcast %170 : vector<1x1024xf32> to vector<2x1024xf32>
    %172 = arith.addf %169, %171 : vector<2x1024xf32>
    %173 = vector.extract_strided_slice %132 {offsets = [1, 0], sizes = [1, 1024], strides = [1, 1]} : vector<3x1024xf32> to vector<1x1024xf32>
    %174 = vector.extract_strided_slice %132 {offsets = [2, 0], sizes = [1, 1024], strides = [1, 1]} : vector<3x1024xf32> to vector<1x1024xf32>
    %cst_63 = arith.constant dense<0.000000e+00> : vector<1024xf32>
    %175 = vector.multi_reduction <add>, %172, %cst_63 [0] : vector<2x1024xf32> to vector<1024xf32>
    %176 = vector.shape_cast %175 : vector<1024xf32> to vector<1x1024xf32>
    %cst_64 = arith.constant 2.000000e+00 : f32
    %177 = vector.broadcast %cst_64 : f32 to vector<1x1024xf32>
    %178 = arith.divf %176, %177 : vector<1x1024xf32>
    %179 = vector.broadcast %178 : vector<1x1024xf32> to vector<2x1024xf32>
    %180 = arith.subf %172, %179 : vector<2x1024xf32>
    %181 = arith.mulf %180, %180 : vector<2x1024xf32>
    %cst_65 = arith.constant dense<0.000000e+00> : vector<1024xf32>
    %182 = vector.multi_reduction <add>, %181, %cst_65 [0] : vector<2x1024xf32> to vector<1024xf32>
    %183 = vector.shape_cast %182 : vector<1024xf32> to vector<1x1024xf32>
    %cst_66 = arith.constant 2.000000e+00 : f32
    %184 = vector.broadcast %cst_66 : f32 to vector<1x1024xf32>
    %185 = arith.divf %183, %184 : vector<1x1024xf32>
    %186 = vector.broadcast %178 : vector<1x1024xf32> to vector<2x1024xf32>
    %187 = arith.subf %172, %186 : vector<2x1024xf32>
    %188 = vector.broadcast %173 : vector<1x1024xf32> to vector<2x1024xf32>
    %189 = arith.mulf %188, %187 : vector<2x1024xf32>
    %cst_67 = arith.constant 9.99999974E-6 : f32
    %190 = vector.broadcast %cst_67 : f32 to vector<1x1024xf32>
    %191 = arith.addf %185, %190 : vector<1x1024xf32>
    %192 = math.rsqrt %191 : vector<1x1024xf32>
    %193 = vector.broadcast %192 : vector<1x1024xf32> to vector<2x1024xf32>
    %194 = arith.mulf %189, %193 : vector<2x1024xf32>
    %195 = vector.broadcast %174 : vector<1x1024xf32> to vector<2x1024xf32>
    %196 = arith.addf %194, %195 : vector<2x1024xf32>
    %cst_68 = arith.constant 0.000000e+00 : f32
    %197 = vector.broadcast %cst_68 : f32 to vector<2x1024xf32>
    %198 = arith.cmpf ogt, %196, %197 : vector<2x1024xf32>
    %cst_69 = arith.constant 0.000000e+00 : f32
    %199 = vector.broadcast %cst_69 : f32 to vector<2x1024xf32>
    %200 = arith.minimumf %196, %199 : vector<2x1024xf32>
    %201 = math.exp %200 : vector<2x1024xf32>
    %cst_70 = arith.constant 1.000000e+00 : f32
    %202 = vector.broadcast %cst_70 : f32 to vector<2x1024xf32>
    %203 = arith.subf %201, %202 : vector<2x1024xf32>
    %204 = arith.select %198, %196, %203 : vector<2x1024xi1>, vector<2x1024xf32>
    %c0_71 = arith.constant 0 : index
    %c0_72 = arith.constant 0 : index
    %205 = vector.load %arg11[%c0_71, %c0_72] : memref<2x1024xf32, #tpu.memory_space<vmem>>, vector<2x1024xf32>
    tpu.vector_store %arg11[%c0_71, %c0_72], %204 {strides = array<i32>} : memref<2x1024xf32, #tpu.memory_space<vmem>>, vector<2x1024xf32>,
    return
  }
}

module attributes {stable_mosaic.version = 11 : i64} {
  func.func @_combine_linear_kernel(%arg0: i32, %arg1: memref<12x32xf32, #tpu.memory_space<vmem>>, %arg2: memref<12x32xf32, #tpu.memory_space<vmem>>, %arg3: memref<12x2xf32, #tpu.memory_space<vmem>>, %arg4: memref<32x64xf32, #tpu.memory_space<vmem>>, %arg5: memref<1x64xf32, #tpu.memory_space<vmem>>, %arg6: memref<12x64xf32, #tpu.memory_space<vmem>>) attributes {dimension_semantics = [#tpu.dimension_semantics<parallel>], iteration_bounds = array<i64: 1>, scalar_prefetch = 0 : i64, scratch_operands = 0 : i64, tpu.core_type = #tpu.core_type<tc>, window_params = [{transform_indices = @transform_0, window_bounds = array<i64: 12, 32>}, {transform_indices = @transform_1, window_bounds = array<i64: 12, 32>}, {transform_indices = @transform_2, window_bounds = array<i64: 12, 2>}, {pipeline_mode = #tpu.pipeline_mode<synchronous>, transform_indices = @transform_3, window_bounds = array<i64: 32, 64>}, {pipeline_mode = #tpu.pipeline_mode<synchronous>, transform_indices = @transform_4, window_bounds = array<i64: 1, 64>}, {transform_indices = @transform_5, window_bounds = array<i64: 12, 64>}]} {
    %c0 = arith.constant 0 : index
    %c0_0 = arith.constant 0 : index
    %0 = vector.load %arg1[%c0, %c0_0] : memref<12x32xf32, #tpu.memory_space<vmem>>, vector<12x32xf32>
    %c0_1 = arith.constant 0 : index
    %c0_2 = arith.constant 0 : index
    %1 = vector.load %arg3[%c0_1, %c0_2] : memref<12x2xf32, #tpu.memory_space<vmem>>, vector<12x1xf32>
    %2 = vector.broadcast %1 : vector<12x1xf32> to vector<12x32xf32>
    %3 = arith.mulf %0, %2 : vector<12x32xf32>
    %c0_3 = arith.constant 0 : index
    %c0_4 = arith.constant 0 : index
    %4 = vector.load %arg2[%c0_3, %c0_4] : memref<12x32xf32, #tpu.memory_space<vmem>>, vector<12x32xf32>
    %c0_5 = arith.constant 0 : index
    %c1 = arith.constant 1 : index
    %5 = vector.load %arg3[%c0_5, %c1] : memref<12x2xf32, #tpu.memory_space<vmem>>, vector<12x1xf32>
    %6 = vector.broadcast %5 : vector<12x1xf32> to vector<12x32xf32>
    %7 = arith.mulf %4, %6 : vector<12x32xf32>
    %8 = arith.addf %3, %7 : vector<12x32xf32>
    %c0_6 = arith.constant 0 : index
    %c0_7 = arith.constant 0 : index
    %9 = vector.load %arg4[%c0_6, %c0_7] : memref<32x64xf32, #tpu.memory_space<vmem>>, vector<32x64xf32>
    %cst = arith.constant dense<0.000000e+00> : vector<12x64xf32>
    %10 = tpu.matmul %8, %9, %cst {dimension_numbers = #tpu.dot_dimension_numbers<[1], [0], [0], [1], [0, 0, 1, 1], [], []>} : vector<12x32xf32>, vector<32x64xf32>, vector<12x64xf32> -> vector<12x64xf32>
    %c0_8 = arith.constant 0 : index
    %c0_9 = arith.constant 0 : index
    %11 = vector.load %arg5[%c0_8, %c0_9] : memref<1x64xf32, #tpu.memory_space<vmem>>, vector<1x64xf32>
    %12 = vector.broadcast %11 : vector<1x64xf32> to vector<12x64xf32>
    %13 = arith.addf %10, %12 : vector<12x64xf32>
    %c0_10 = arith.constant 0 : index
    %c0_11 = arith.constant 0 : index
    %14 = vector.load %arg6[%c0_10, %c0_11] : memref<12x64xf32, #tpu.memory_space<vmem>>, vector<12x64xf32>
    tpu.vector_store %arg6[%c0_10, %c0_11], %13 {strides = array<i32>} : memref<12x64xf32, #tpu.memory_space<vmem>>, vector<12x64xf32>,
    return
  }
  func.func @transform_0(%arg0: i32) -> (i32, i32) {
    %c0_i32 = arith.constant 0 : i32
    %c0_i32_0 = arith.constant 0 : i32
    return %arg0, %c0_i32 : i32, i32
  }
  func.func @transform_1(%arg0: i32) -> (i32, i32) {
    %c0_i32 = arith.constant 0 : i32
    %c0_i32_0 = arith.constant 0 : i32
    return %arg0, %c0_i32 : i32, i32
  }
  func.func @transform_2(%arg0: i32) -> (i32, i32) {
    %c0_i32 = arith.constant 0 : i32
    %c0_i32_0 = arith.constant 0 : i32
    return %arg0, %c0_i32 : i32, i32
  }
  func.func @transform_3(%arg0: i32) -> (i32, i32) {
    %c0_i32 = arith.constant 0 : i32
    %c0_i32_0 = arith.constant 0 : i32
    %c0_i32_1 = arith.constant 0 : i32
    return %c0_i32, %c0_i32_0 : i32, i32
  }
  func.func @transform_4(%arg0: i32) -> (i32, i32) {
    %c0_i32 = arith.constant 0 : i32
    %c0_i32_0 = arith.constant 0 : i32
    %c0_i32_1 = arith.constant 0 : i32
    return %c0_i32, %c0_i32_0 : i32, i32
  }
  func.func @transform_5(%arg0: i32) -> (i32, i32) {
    %c0_i32 = arith.constant 0 : i32
    %c0_i32_0 = arith.constant 0 : i32
    return %arg0, %c0_i32 : i32, i32
  }
}

</mosaic_0001>

<bundles_post_ra>
// kernel: attpooling_forward.3
= control target key start
LH: loop header
LB: loop body
LE: loop exit
PB: predicated region body
PF: predicated region fallthrough
CT: control target
= control target key end

     0   :  { %v177_v0 = vmov 0   ;;  %v178_v5 = vmov 1   ;;  %vm61_vm0 = vcmask 261120   ;;  %vm145_vm1 = vcmask 519168   ;;  %s248_s2 = inlined_call_operand.vmem [shape: f32[12,2], index: 2, kind: input, shape index: {}]   ;;  %s249_s3 = inlined_call_operand.vmem [shape: f32[32,64], index: 3, kind: input, shape index: {}]   ;;  %s250_s0 = inlined_call_operand.vmem [shape: f32[12,32], index: 0, kind: input, shape index: {}]   ;;  %s251_s1 = inlined_call_operand.vmem [shape: f32[12,32], index: 1, kind: input, shape index: {}]   ;;  %s252_s4 = inlined_call_operand.vmem [shape: f32[1,64], index: 4, kind: input, shape index: {}]   ;;  %s253_s5 = inlined_call_operand.vmem [shape: f32[12,64], index: 5, kind: output, shape index: {}]  }
   0x1   :  { %175 = vset.pattern.permute.xlu1 %v177_v0  ;;  %173 = vset.pattern.permute.xlu0 %v177_v0  ;;  %v23_v1 = vld [vmem:[%s248_s2 + $0x8] sm:$0xf]  ;;  %v22_v2 = vld [vmem:[%s248_s2] sm:$0xff]  ;;  %v53_v3 = vld [vmem:[%s249_s3 + $0x18] sm:$0xff]  ;;  %vm143_vm2 = vcmask 523264  }
   0x2   :  { %31 = vperm.xlu1 %175, %v23_v1   ;;  %26 = vperm.xlu0 %173, %v22_v2   ;;  %v52_v4 = vld [vmem:[%s249_s3 + $0x10] sm:$0xff]  ;;  %v51_v6 = vld [vmem:[%s249_s3 + $0x8] sm:$0xff]  ;;  %v50_v7 = vld [vmem:[%s249_s3] sm:$0xff] }
   0x3   :  { %160 = vmatprep.subr.mxu0 %v53_v3  ;;  %v20_v10 = vld [vmem:[%s250_s0] sm:$0xff]  ;;  %v21_v11 = vld [vmem:[%s250_s0 + $0x8] sm:$0xf] }
   0x4   :  { %161 = vmatpush3.msra.mxu0 %v53_v3  ;;  %v37_v12 = vld [vmem:[%s251_s1 + $0x8] sm:$0xf]  ;;  %v36_v13 = vld [vmem:[%s251_s1] sm:$0xff] }
   0x5   :  { %162 = vmatprep.subr.mxu0 %v52_v4  ;;  %v151_v22 = vld [vmem:[%s252_s4] ss:$0 sm:$0xff] }
   0x6   :  { %176 = vset.pattern.permute.xlu1 %v178_v5  ;;  %174 = vset.pattern.permute.xlu0 %v178_v5 }
   0x7   :  { %43 = vperm.xlu1 %176, %v23_v1   ;;  %39 = vperm.xlu0 %174, %v22_v2  }
   0x8   :  { %163 = vmatpush3.msra.mxu0 %v52_v4 }
   0x9   :  { %164 = vmatprep.subr.mxu0 %v51_v6 }
   0xa   :  { %165 = vmatpush3.msra.mxu0 %v51_v6 }
   0xb   :  { %166 = vmatprep.subr.mxu0 %v50_v7 }
   0xc   :  { %167 = vmatpush3.msra.mxu0 %v50_v7 }
  0x7d   :  { %v27_v8 = vpop.permute.xlu0 %26  ;;  %v32_v9 = vpop.permute.xlu1 %31 }
  0x7e   :  { %v34_v16 = vmul.f32 %v27_v8, %v20_v10  ;;  %v35_v17 = vmul.f32 %v32_v9, %v21_v11 }
  0x82   :  { %v44_v14 = vpop.permute.xlu1 %43  ;;  %v40_v15 = vpop.permute.xlu0 %39 }
  0x83   :  { %v47_v18 = vmul.f32 %v44_v14, %v37_v12  ;;  %v46_v19 = vmul.f32 %v40_v15, %v36_v13 }
  0x85   :  { %v49_v20 = vadd.f32 %v47_v18, %v35_v17  ;;  %v48_v21 = vadd.f32 %v46_v19, %v34_v16 }
  0x87   :  { %168 = vmatprep.mubr.msk.f32.mxu0 %vm61_vm0, %v48_v21 }
  0x88   :  { %169 = vmatmul.mubr.msk.f32.vlgmr.msra.gmra.mxu0 %vm61_vm0, %v49_v20 }
 0x148   :  { %v170_v23 = vpop.f32.mrf.mxu0 }
 0x149   :  { %v140_v24 = vadd.f32 %v170_v23, %v151_v22 }
 0x14a   :  { %v134_v25 = vpop.f32.mrf.mxu0 }
 0x14b   :  { %146 = vst.msk [vmem:[%s253_s5 + $0x8] sm:$0xf] %vm145_vm1, %v140_v24  ;;  %v135_v26 = vadd.f32 %v151_v22, %v134_v25 }
 0x14d   :  { %144 = vst.msk [vmem:[%s253_s5] sm:$0xff] %vm143_vm2, %v135_v26 }

// kernel: attpooling_forward.2
= control target key start
LH: loop header
LB: loop body
LE: loop exit
PB: predicated region body
PF: predicated region fallthrough
CT: control target
= control target key end

     0   :  { %17 = vsyncpa [#allocation3], 0  ;;  %s3129_s0 = inlined_call_operand.vmem [shape: s32[1,12], index: 0, kind: input, shape index: {}]   ;;  %s3130_s1 = inlined_call_operand.vmem [shape: f32[12,32], index: 1, kind: input, shape index: {}]   ;;  %s3131_s2 = inlined_call_operand.hbm [shape: f32[12,32], index: 2, kind: input, shape index: {}]   ;;  %s3132_s3 = inlined_call_operand.vmem [shape: f32[2,32], index: 3, kind: input, shape index: {}]   ;;  %s3133_s4 = inlined_call_operand.hbm [shape: f32[32,64], index: 4, kind: input, shape index: {}]   ;;  %s3134_s5 = inlined_call_operand.hbm [shape: f32[32,64], index: 5, kind: input, shape index: {}]   ;;  %s3135_s6 = inlined_call_operand.hbm [shape: f32[64,1024], index: 6, kind: input, shape index: {}]   ;;  %s3136_s7 = inlined_call_operand.hbm [shape: f32[64,1024], index: 7, kind: input, shape index: {}]   ;;  %s3137_s8 = inlined_call_operand.hbm [shape: f32[6,64], index: 8, kind: input, shape index: {}]   ;;  %s3138_s9 = inlined_call_operand.hbm [shape: f32[6,1024], index: 9, kind: input, shape index: {}]   ;;  %s3139_s10 = inlined_call_operand.vmem [shape: f32[2,1024], index: 10, kind: output, shape index: {0}]   ;;  %s3140_s11 = inlined_call_operand.vmem [shape: f32[2,1024], index: 11, kind: output, shape index: {1}]  }
   0x1   :  { %18 = vsyncpa [#allocation5], 0 }
   0x2   :  { %19 = vsyncpa [#allocation8], 0 }
   0x3   :  { %20 = vsyncpa [#allocation11], 0  ;;  %s2567_s17 = smov [#allocation4]   ;;  %s2568_s19 = smov [#allocation7]  }
   0x4   :  { %s44_s18 = sshll.u32 %s2567_s17, 4  ;;  %s68_s20 = sshll.u32 %s2568_s19, 4  ;;  %s45_s18 = int_to_ptr.vmem [resolvable:$true] %s44_s18  ;;  %s69_s20 = int_to_ptr.vmem [resolvable:$true] %s68_s20 }
   0x5   :  { %s2427_s21 = scalar_lea.vmem %s45_s18, 512  ;;  %p2432_p1 = scmp.lt.s32.totalorder %s45_s18, %s45_s18 }
   0x6   :  { %p2428_p0 = scmp.ne.s32.totalorder %s45_s18, %s2427_s21  ;;  %p2433_p2 = scmp.lt.s32.totalorder %s2427_s21, %s2427_s21 }
   0x8   :  { %p2434_p3 = por %p2433_p2, %p2432_p1 }
   0xa   :  { %p2435_p4 = pnand %p2434_p3, %p2428_p0 }
   0xc   :  { %2438 = shalt.err (!%p2435_p4)
}
   0xd   :  { %s2569_s22 = smov 128   ;;  %s2570_s23 = smov 8  }
   0xe   :  { %50 = dma.hbm_to_vmem [thread:$0]  %s3133_s4, 512, %s45_s18, [#allocation5], %s2569_s22, %s2569_s22, %s2570_s23  }
   0xf   :  { %s2447_s26 = scalar_lea.vmem %s69_s20, 8192  ;;  %p2452_p6 = scmp.lt.s32.totalorder %s69_s20, %s69_s20 }
  0x10   :  { %p2448_p5 = scmp.ne.s32.totalorder %s69_s20, %s2447_s26  ;;  %p2453_p7 = scmp.lt.s32.totalorder %s2447_s26, %s2447_s26 }
  0x12   :  { %p2454_p8 = por %p2453_p7, %p2452_p6 }
  0x14   :  { %p2455_p9 = pnand %p2454_p8, %p2448_p5 }
  0x16   :  { %2458 = shalt.err (!%p2455_p9)
}
  0x17   :  { %s2571_s27 = smov 1024   ;;  %s2572_s28 = smov 64  }
  0x18   :  { %74 = dma.hbm_to_vmem [thread:$0]  %s3135_s6, 8192, %s69_s20, [#allocation8], %s2571_s27, %s2571_s27, %s2572_s28  }
  0x19   :  { %s2573_s12 = smov [#allocation10]   ;;  %s2574_s14 = smov [#allocation2]  }
  0x1a   :  { %s93_s13 = sshll.u32 %s2573_s12, 4  ;;  %s30_s4 = sshll.u32 %s2574_s14, 4  ;;  %s94_s13 = int_to_ptr.vmem [resolvable:$true] %s93_s13  ;;  %s31_s4 = int_to_ptr.vmem [resolvable:$true] %s30_s4 }
  0x1b   :  { %s2467_s15 = scalar_lea.vmem %s94_s13, 128  ;;  %p2472_p11 = scmp.lt.s32.totalorder %s94_s13, %s94_s13 }
  0x1c   :  { %p2468_p10 = scmp.ne.s32.totalorder %s94_s13, %s2467_s15  ;;  %p2473_p12 = scmp.lt.s32.totalorder %s2467_s15, %s2467_s15 }
  0x1e   :  { %p2474_p13 = por %p2473_p12, %p2472_p11 }
  0x20   :  { %p2475_p0 = pnand %p2474_p13, %p2468_p10 }
  0x22   :  { %2478 = shalt.err (!%p2475_p0)
}
  0x23   :  { %96 = dma.hbm_to_vmem [thread:$0]  %s3137_s8, 128, %s94_s13, [#allocation11]  }
  0x24   :  { %s2487_s18 = scalar_lea.vmem %s31_s4, 256  ;;  %p2492_p2 = scmp.lt.s32.totalorder %s31_s4, %s31_s4 }
  0x25   :  { %p2488_p1 = scmp.ne.s32.totalorder %s31_s4, %s2487_s18  ;;  %p2493_p3 = scmp.lt.s32.totalorder %s2487_s18, %s2487_s18 }
  0x27   :  { %p2494_p4 = por %p2493_p3, %p2492_p2 }
  0x29   :  { %p2495_p5 = pnand %p2494_p4, %p2488_p1 }
  0x2b   :  { %2498 = shalt.err (!%p2495_p5)
}
  0x2c   :  { %36 = dma.hbm_to_vmem [thread:$0]  %s3131_s2, 256, %s31_s4, [#allocation3], %s2569_s22, %s2569_s22, %s2570_s23  }
  0x2d   :  { %s2575_s20 = smov [#allocation6]   ;;  %s2576_s24 = smov [#allocation9]  }
  0x2e   :  { %s56_s21 = sshll.u32 %s2575_s20, 4  ;;  %s80_s25 = sshll.u32 %s2576_s24, 4  ;;  %s57_s21 = int_to_ptr.vmem [resolvable:$true] %s56_s21  ;;  %s81_s25 = int_to_ptr.vmem [resolvable:$true] %s80_s25 }
  0x2f   :  { %s2507_s8 = scalar_lea.vmem %s57_s21, 512  ;;  %p2512_p7 = scmp.lt.s32.totalorder %s57_s21, %s57_s21 }
  0x30   :  { %p2508_p6 = scmp.ne.s32.totalorder %s57_s21, %s2507_s8  ;;  %p2513_p8 = scmp.lt.s32.totalorder %s2507_s8, %s2507_s8 }
  0x32   :  { %p2514_p9 = por %p2513_p8, %p2512_p7 }
  0x34   :  { %p2515_p10 = pnand %p2514_p9, %p2508_p6 }
  0x36   :  { %2518 = shalt.err (!%p2515_p10)
}
  0x37   :  { %62 = dma.hbm_to_vmem [thread:$0]  %s3134_s5, 512, %s57_s21, [#allocation5], %s2569_s22, %s2569_s22, %s2570_s23  }
  0x38   :  { %s2527_s2 = scalar_lea.vmem %s81_s25, 8192  ;;  %p2532_p12 = scmp.lt.s32.totalorder %s81_s25, %s81_s25 }
  0x39   :  { %p2528_p11 = scmp.ne.s32.totalorder %s81_s25, %s2527_s2  ;;  %p2533_p13 = scmp.lt.s32.totalorder %s2527_s2, %s2527_s2 }
  0x3b   :  { %p2534_p0 = por %p2533_p13, %p2532_p12 }
  0x3d   :  { %p2535_p1 = pnand %p2534_p0, %p2528_p11 }
  0x3f   :  { %2538 = shalt.err (!%p2535_p1)
}
  0x40   :  { %86 = dma.hbm_to_vmem [thread:$0]  %s3136_s7, 8192, %s81_s25, [#allocation8], %s2571_s27, %s2571_s27, %s2572_s28  }
  0x41   :  { %s2577_s13 = smov [#allocation12]  }
  0x42   :  { %s103_s14 = sshll.u32 %s2577_s13, 4  ;;  %s104_s14 = int_to_ptr.vmem [resolvable:$true] %s103_s14 }
  0x43   :  { %s2547_s4 = scalar_lea.vmem %s104_s14, 1024  ;;  %p2552_p3 = scmp.lt.s32.totalorder %s104_s14, %s104_s14 }
  0x44   :  { %p2548_p2 = scmp.ne.s32.totalorder %s104_s14, %s2547_s4  ;;  %p2553_p4 = scmp.lt.s32.totalorder %s2547_s4, %s2547_s4 }
  0x46   :  { %p2554_p5 = por %p2553_p4, %p2552_p3 }
  0x48   :  { %p2555_p6 = pnand %p2554_p5, %p2548_p2 }
  0x4a   :  { %2558 = shalt.err (!%p2555_p6)
}
  0x4b   :  { %106 = dma.hbm_to_vmem [thread:$0]  %s3138_s9, 1024, %s104_s14, [#allocation11]  }
  0x4c   :  { %2559 = dma.done.wait [#allocation3], 256  }
  0x4d   :  { %2560 = vsyncadd [#allocation3], 4294967040 }
  0x4e   :  { %2561 = dma.done.wait [#allocation5], 1024  }
  0x4f   :  { %2562 = vsyncadd [#allocation5], 4294966272 }
  0x50   :  { %2563 = dma.done.wait [#allocation8], 16384  }
  0x51   :  { %2564 = vsyncadd [#allocation8], 4294950912 }
  0x52   :  { %2565 = dma.done.wait [#allocation11], 1152  }
  0x53   :  { %2566 = vsyncadd [#allocation11], 4294966144  ;;  %v2578_v0 = vmov 0.0   ;;  %vm2579_vm0 = vmmov 0   ;;  %vm152_vm1 = vcmask 261120   ;;  %v147_v2 = vld [vmem:[%s3130_s1] sm:$0xff]  ;;  %v129_v4 = vlaneseq }
  0x54   :  { %2266 = vmatprep.subr.mxu0 %v2578_v0  ;;  %2270 = vmatprep.mubr.msk.f32.mxu0 %vm2579_vm0, %v2578_v0  ;;  %v148_v1 = vld [vmem:[%s3130_s1 + $0x8] sm:$0xf]  ;;  %v151_v3 = vld [vmem:[%s3132_s3] sm:$0x1]  ;;  %vm238_vm4 = vcmask 91136   ;;  %vm256_vm5 = vcmask 1043456  }
  0x55   :  { %2273 = vmatprep.subr.mxu1 %v2578_v0  ;;  %2277 = vmatprep.mubr.msk.f32.mxu1 %vm2579_vm0, %v2578_v0  ;;  %v2697_v5 = vshrl.u32 %v129_v4, 7  ;;  %v2204_v6 = vld [vmem:[%s3129_s0] ss:$0 sm:$0xff]  ;;  %vm252_vm6 = vcmask 97280   ;;  %v332_v24 = vld [vmem:[#allocation4 + $0x18] sm:$0xff]  ;;  %v330_v26 = vld [vmem:[#allocation4 + $0x8] sm:$0xff] }
  0x56   :  { %2267 = vmatpush3.xpose.msk.msra.mxu0 %vm152_vm1, %v148_v1  ;;  %2274 = vmatpush3.msk.msra.mxu1 %vm256_vm5, %v148_v1  ;;  %v331_v25 = vld [vmem:[#allocation4 + $0x10] sm:$0xff]  ;;  %v329_v27 = vld [vmem:[#allocation4] sm:$0xff]  ;;  %v390_v30 = vld [vmem:[#allocation7 + $0x1c8] sm:$0xff]  ;;  %vm474_vm7 = vcmask 517120   ;;  %vm545_vm8 = vcmask 523264   ;;  %vm833_vm10 = vcmask 1041408  }
  0x57   :  { %2268 = vmatprep.subr.mxu0 %v2578_v0  ;;  %vm135_vm2 = vcmp.eq.s32.totalorder %v2204_v6, %v2697_v5  ;;  %v2704_v7 = vsub.s32 0, %v2697_v5  ;;  %2275 = vmatprep.subr.mxu1 %v2578_v0  ;;  %v392_v31 = vld [vmem:[#allocation7 + $0x1d8] sm:$0xff]  ;;  %v389_v32 = vld [vmem:[#allocation7 + $0x1c0] sm:$0xff]  ;;  %v391_v33 = vld [vmem:[#allocation7 + $0x1d0] sm:$0xff] }
  0x58   :  { %v2707_v8 = vsel %vm135_vm2, 1.0, %v2578_v0  ;;  %2276 = vmatpush3.msra.mxu1 %v147_v2  ;;  %v382_v34 = vld [vmem:[#allocation7 + $0x188] sm:$0xff]  ;;  %v384_v35 = vld [vmem:[#allocation7 + $0x198] sm:$0xff]  ;;  %v381_v36 = vld [vmem:[#allocation7 + $0x180] sm:$0xff] }
  0x59   :  { %vm232_vm3 = vcmp.gt.f32.partialorder %v2707_v8, 0.0  ;;  %2280 = vmatprep.subr.mxu1 %v2578_v0  ;;  %v383_v37 = vld [vmem:[#allocation7 + $0x190] sm:$0xff]  ;;  %v374_v38 = vld [vmem:[#allocation7 + $0x148] sm:$0xff]  ;;  %v376_v39 = vld [vmem:[#allocation7 + $0x158] sm:$0xff] }
  0x5a   :  { %2269 = vmatpush3.xpose.msk.msra.mxu0 %vm152_vm1, %v147_v2  ;;  %v373_v40 = vld [vmem:[#allocation7 + $0x140] sm:$0xff]  ;;  %v375_v41 = vld [vmem:[#allocation7 + $0x150] sm:$0xff]  ;;  %v366_v42 = vld [vmem:[#allocation7 + $0x108] sm:$0xff] }
  0x5b   :  { %565 = vmatprep.subr.mxu0 %v390_v30  ;;  %v368_v43 = vld [vmem:[#allocation7 + $0x118] sm:$0xff]  ;;  %v365_v44 = vld [vmem:[#allocation7 + $0x100] sm:$0xff]  ;;  %v367_v45 = vld [vmem:[#allocation7 + $0x110] sm:$0xff]  ;;  %v2735_v30 = vsub.s32 2, %v2697_v5 }
  0x5c   :  { %v358_v46 = vld [vmem:[#allocation7 + $0xc8] sm:$0xff]  ;;  %v360_v47 = vld [vmem:[#allocation7 + $0xd8] sm:$0xff]  ;;  %v357_v48 = vld [vmem:[#allocation7 + $0xc0] sm:$0xff] }
  0x5d   :  { %2271 = vmatmul.mubr.msk.f32.vlgmr.msra.gmra.mxu0 %vm152_vm1, %v151_v3  ;;  %v359_v49 = vld [vmem:[#allocation7 + $0xd0] sm:$0xff]  ;;  %v350_v50 = vld [vmem:[#allocation7 + $0x88] sm:$0xff]  ;;  %v352_v51 = vld [vmem:[#allocation7 + $0x98] sm:$0xff] }
  0x5e   :  { %613 = vmatprep.mubr.f32.mxu0 %v2578_v0  ;;  %566 = vmatpush1.msra.mxu0 %v389_v32  ;;  %v349_v52 = vld [vmem:[#allocation7 + $0x80] sm:$0xff]  ;;  %v351_v53 = vld [vmem:[#allocation7 + $0x90] sm:$0xff]  ;;  %v342_v54 = vld [vmem:[#allocation7 + $0x48] sm:$0xff] }
  0x5f   :  { %567 = vmatprep.subr.mxu0 %v382_v34  ;;  %v344_v55 = vld [vmem:[#allocation7 + $0x58] sm:$0xff]  ;;  %v341_v56 = vld [vmem:[#allocation7 + $0x40] sm:$0xff]  ;;  %v343_v57 = vld [vmem:[#allocation7 + $0x50] sm:$0xff] }
  0x60   :  { %568 = vmatpush1.msra.mxu0 %v381_v36  ;;  %v334_v58 = vld [vmem:[#allocation7 + $0x8] sm:$0xff]  ;;  %v336_v59 = vld [vmem:[#allocation7 + $0x18] sm:$0xff]  ;;  %v333_v60 = vld [vmem:[#allocation7] sm:$0xff] }
  0x61   :  { %569 = vmatprep.subr.mxu0 %v374_v38  ;;  %v335_v61 = vld [vmem:[#allocation7 + $0x10] sm:$0xff]  ;;  %v394_v62 = vld [vmem:[#allocation7 + $0x1e8] sm:$0xff]  ;;  %v396_v63 = vld [vmem:[#allocation7 + $0x1f8] sm:$0xff] }
  0x62   :  { %570 = vmatpush1.msra.mxu0 %v373_v40  ;;  %v138_v1 = vld [vmem:[#allocation10] sm:$0x3f] }
  0x63   :  { %571 = vmatprep.subr.mxu0 %v366_v42  ;;  %v400_v2 = vrot.slane %v138_v1, %v2704_v7  ;;  %v505_v32 = vrot.slane %v138_v1, %v2735_v30  ;;  %v393_v40 = vld [vmem:[#allocation7 + $0x1e0] sm:$0xff] }
  0x64   :  { %572 = vmatpush1.msra.mxu0 %v365_v44  ;;  %v388_v44 = vld [vmem:[#allocation7 + $0x1b8] sm:$0xff] }
  0x65   :  { %573 = vmatprep.subr.mxu0 %v358_v46  ;;  %v387_v46 = vld [vmem:[#allocation7 + $0x1b0] sm:$0xff] }
  0x66   :  { %574 = vmatpush1.msra.mxu0 %v357_v48  ;;  %v380_v48 = vld [vmem:[#allocation7 + $0x178] sm:$0xff] }
  0x67   :  { %575 = vmatprep.subr.mxu0 %v350_v50  ;;  %v379_v50 = vld [vmem:[#allocation7 + $0x170] sm:$0xff] }
  0x68   :  { %576 = vmatpush1.msra.mxu0 %v349_v52  ;;  %v372_v52 = vld [vmem:[#allocation7 + $0x138] sm:$0xff] }
  0x69   :  { %577 = vmatprep.subr.mxu0 %v342_v54  ;;  %v371_v54 = vld [vmem:[#allocation7 + $0x130] sm:$0xff] }
  0x6a   :  { %578 = vmatpush1.msra.mxu0 %v341_v56  ;;  %v364_v56 = vld [vmem:[#allocation7 + $0xf8] sm:$0xff] }
  0x6b   :  { %579 = vmatprep.subr.mxu0 %v334_v58  ;;  %v363_v58 = vld [vmem:[#allocation7 + $0xf0] sm:$0xff] }
  0x6c   :  { %580 = vmatpush1.msra.mxu0 %v333_v60  ;;  %v356_v60 = vld [vmem:[#allocation7 + $0xb8] sm:$0xff] }
  0x6d   :  { %707 = vmatprep.subr.mxu0 %v394_v62  ;;  %v355_v62 = vld [vmem:[#allocation7 + $0xb0] sm:$0xff] }
 0x11d   :  { %v228_v9 = vpop.f32.mrf.mxu0 }
 0x11e   :  { %v236_v10 = vrot.slane %v228_v9, %v2704_v7 }
 0x11f   :  { %v2272_v11 = vpop.f32.mrf.mxu0 }
 0x120   :  { %v237_v12 = vsel %vm232_vm3, %v236_v10, -1e+30 }
 0x121   :  { %v239_v13 = vsel %vm238_vm4, %v237_v12, -inf }
 0x122   :  { %240 = vmax.xlane.f32.xlu0 %v239_v13 }
 0x1ab   :  { %v241_v14 = vpop.xlane.xlu0 %240 }
 0x1ac   :  { %v242_v15 = vsub.f32 %v237_v12, %v241_v14 }
 0x1ae   :  { %v243_v16 = vmul.f32 1.442695, %v242_v15 }
 0x1b0   :  { %2330 = vpow2.f32 %v243_v16 }
 0x1bd   :  { %v2331_v17 = vpop.eup %2330 }
 0x1be   :  { %v245_v18 = vmul.f32 %v2331_v17, %v2707_v8 }
 0x1c0   :  { %v246_v19 = vsel %vm238_vm4, %v245_v18, 0.0 }
 0x1c1   :  { %247 = vadd.xlane.f32.xlu0 %v246_v19 }
 0x24a   :  { %v248_v20 = vpop.xlane.xlu0 %247 }
 0x24b   :  { %v249_v21 = vmax.f32 %v248_v20, 1e-30 }
 0x24d   :  { %2332 = vrcp.f32 %v249_v21 }
 0x25a   :  { %v2333_v22 = vpop.eup %2332 }
 0x25b   :  { %v251_v23 = vmul.f32 %v2333_v22, %v245_v18 }
 0x25d   :  { %2278 = vmatmul.mubr.msk.f32.vlgmr.msra.gmra.mxu1 %vm252_vm6, %v251_v23 }
 0x25e   :  { %2281 = vmatpush3.msra.mxu1 %v332_v24  ;;  %2288 = vmatprep.mubr.msk.f32.mxu1 %vm2579_vm0, %v2578_v0 }
 0x25f   :  { %2282 = vmatprep.subr.mxu1 %v2578_v0 }
 0x260   :  { %2283 = vmatpush3.msra.mxu1 %v331_v25 }
 0x261   :  { %2284 = vmatprep.subr.mxu1 %v2578_v0 }
 0x262   :  { %2285 = vmatpush3.msra.mxu1 %v330_v26 }
 0x263   :  { %2286 = vmatprep.subr.mxu1 %v2578_v0 }
 0x264   :  { %2287 = vmatpush3.msra.mxu1 %v329_v27 }
 0x265   :  { %636 = vmatprep.subr.mxu1 %v392_v31 }
 0x31d   :  { %v325_v28 = vpop.f32.mrf.mxu1 }
 0x31e   :  { %2289 = vmatmul.mubr.msk.f32.vlgmr.msra.gmra.mxu1 %vm152_vm1, %v325_v28  ;;  %v2731_v28 = vsub.s32 1, %v2697_v5 }
 0x31f   :  { %v2279_v29 = vpop.f32.mrf.mxu1  ;;  %684 = vmatprep.mubr.f32.mxu1 %v2578_v0  ;;  %637 = vmatpush1.msra.mxu1 %v391_v33 }
 0x320   :  { %638 = vmatprep.subr.mxu1 %v384_v35  ;;  %v497_v29 = vrot.slane %v138_v1, %v2731_v28  ;;  %v348_v1 = vld [vmem:[#allocation7 + $0x78] sm:$0xff] }
 0x321   :  { %639 = vmatpush1.msra.mxu1 %v383_v37 }
 0x322   :  { %640 = vmatprep.subr.mxu1 %v376_v39 }
 0x323   :  { %641 = vmatpush1.msra.mxu1 %v375_v41  ;;  %v395_v41 = vld [vmem:[#allocation7 + $0x1f0] sm:$0xff] }
 0x324   :  { %642 = vmatprep.subr.mxu1 %v368_v43  ;;  %v386_v43 = vld [vmem:[#allocation7 + $0x1a8] sm:$0xff] }
 0x325   :  { %643 = vmatpush1.msra.mxu1 %v367_v45  ;;  %v385_v45 = vld [vmem:[#allocation7 + $0x1a0] sm:$0xff] }
 0x326   :  { %644 = vmatprep.subr.mxu1 %v360_v47  ;;  %v378_v47 = vld [vmem:[#allocation7 + $0x168] sm:$0xff] }
 0x327   :  { %645 = vmatpush1.msra.mxu1 %v359_v49  ;;  %v377_v49 = vld [vmem:[#allocation7 + $0x160] sm:$0xff] }
 0x328   :  { %646 = vmatprep.subr.mxu1 %v352_v51  ;;  %v370_v51 = vld [vmem:[#allocation7 + $0x128] sm:$0xff] }
 0x329   :  { %647 = vmatpush1.msra.mxu1 %v351_v53  ;;  %v369_v53 = vld [vmem:[#allocation7 + $0x120] sm:$0xff] }
 0x32a   :  { %648 = vmatprep.subr.mxu1 %v344_v55  ;;  %v362_v55 = vld [vmem:[#allocation7 + $0xe8] sm:$0xff] }
 0x32b   :  { %649 = vmatpush1.msra.mxu1 %v343_v57  ;;  %v361_v57 = vld [vmem:[#allocation7 + $0xe0] sm:$0xff] }
 0x32c   :  { %650 = vmatprep.subr.mxu1 %v336_v59  ;;  %v354_v59 = vld [vmem:[#allocation7 + $0xa8] sm:$0xff] }
 0x32d   :  { %651 = vmatpush1.msra.mxu1 %v335_v61  ;;  %v353_v61 = vld [vmem:[#allocation7 + $0xa0] sm:$0xff] }
 0x32e   :  { %778 = vmatprep.subr.mxu1 %v396_v63  ;;  %v346_v63 = vld [vmem:[#allocation7 + $0x68] sm:$0xff] }
 0x3de   :  { %v470_v3 = vpop.f32.mrf.mxu1 }
 0x3df   :  { %v471_v4 = vadd.f32 %v470_v3, %v400_v2  ;;  %v345_v2 = vld [vmem:[#allocation7 + $0x60] sm:$0xff]  ;;  %v347_v3 = vld [vmem:[#allocation7 + $0x70] sm:$0xff] }
 0x3e0   :  { %v2290_v6 = vpop.f32.mrf.mxu1 }
 0x3e1   :  { %v475_v9 = vsel %vm474_vm7, %v471_v4, 0.0  ;;  %v340_v6 = vld [vmem:[#allocation7 + $0x38] sm:$0xff] }
 0x3e2   :  { %v476_v10 = vrot.slane %v475_v9, 4 }
 0x3e4   :  { %v477_v11 = vadd.f32 %v476_v10, %v475_v9  ;;  %v337_v9 = vld [vmem:[#allocation7 + $0x20] sm:$0xff]  ;;  %v339_v10 = vld [vmem:[#allocation7 + $0x30] sm:$0xff] }
 0x3e6   :  { %v478_v12 = vrot.slane %v477_v11, 2 }
 0x3e8   :  { %v479_v13 = vadd.f32 %v478_v12, %v477_v11  ;;  %v150_v11 = vld [vmem:[#allocation2 + $0x8] sm:$0xf]  ;;  %v149_v12 = vld [vmem:[#allocation2] sm:$0xff] }
 0x3ea   :  { %v480_v14 = vrot.slane %v479_v13, 1 }
 0x3ec   :  { %v481_v15 = vadd.f32 %v480_v14, %v479_v13  ;;  %v1176_v13 = vld [vmem:[%s3132_s3 + $0x1] sm:$0x1]  ;;  %v2768_v14 = vld [vmem:[#allocation12] sm:$0x3f] }
 0x3ee   :  { %v483_v16 = vmul.f32 0.5, %v481_v15  ;;  %v2770_v15 = vld [vmem:[#allocation12 + $0x10] sm:$0x3f] }
 0x3f0   :  { %v484_v17 = vsub.f32 %v471_v4, %v483_v16  ;;  %v338_v4 = vld [vmem:[#allocation7 + $0x28] sm:$0xff]  ;;  %v2772_v16 = vld [vmem:[#allocation12 + $0x8] sm:$0x3f] }
 0x3f2   :  { %v485_v18 = vmul.f32 %v484_v17, %v484_v17  ;;  %v498_v31 = vmul.f32 %v497_v29, %v484_v17  ;;  %v2774_v17 = vld [vmem:[#allocation12 + $0x18] sm:$0x3f] }
 0x3f4   :  { %v486_v19 = vsel %vm474_vm7, %v485_v18, 0.0  ;;  %v516_v18 = vrot.slane %v2768_v14, %v2704_v7 }
 0x3f5   :  { %v487_v20 = vrot.slane %v486_v19, 4 }
 0x3f7   :  { %v488_v21 = vadd.f32 %v487_v20, %v486_v19  ;;  %v524_v19 = vrot.slane %v2770_v15, %v2704_v7  ;;  %v520_v20 = vrot.slane %v2772_v16, %v2704_v7 }
 0x3f9   :  { %v489_v22 = vrot.slane %v488_v21, 2 }
 0x3fb   :  { %v490_v23 = vadd.f32 %v489_v22, %v488_v21  ;;  %v528_v21 = vrot.slane %v2774_v17, %v2704_v7 }
 0x3fd   :  { %v491_v24 = vrot.slane %v490_v23, 1 }
 0x3ff   :  { %v492_v25 = vadd.f32 %v491_v24, %v490_v23 }
 0x401   :  { %v493_v26 = vmul.f32 0.5, %v492_v25 }
 0x403   :  { %v499_v27 = vadd.f32 1e-05, %v493_v26 }
 0x405   :  { %2334 = vrsqrt.f32 %v499_v27 }
 0x412   :  { %v2335_v33 = vpop.eup %2334 }
 0x413   :  { %v501_v34 = vmul.f32 %v2335_v33, %v498_v31 }
 0x415   :  { %v506_v35 = vadd.f32 %v505_v32, %v501_v34 }
 0x417   :  { %v508_v36 = vmin.f32 %v506_v35, 0.0  ;;  %vm507_vm9 = vcmp.gt.f32.partialorder %v506_v35, 0.0 }
 0x419   :  { %v509_v37 = vmul.f32 1.442695, %v508_v36 }
 0x41b   :  { %2336 = vpow2.f32 %v509_v37 }
 0x428   :  { %v2337_v38 = vpop.eup %2336 }
 0x429   :  { %v2212_v39 = vadd.f32 -1.0, %v2337_v38 }
 0x42b   :  { %v2738_v42 = vsel %vm507_vm9, %v506_v35, %v2212_v39 }
 0x42c   :  { %2213 = vmatmul.mubr.msk.f32.vlgmr.msra.gmra.mxu0 %vm545_vm8, %v2738_v42  ;;  %2214 = vmatmul.mubr.msk.f32.vlgmr.msra.gmra.mxu1 %vm545_vm8, %v2738_v42 }
 0x42d   :  { %708 = vmatpush1.msra.mxu0 %v393_v40  ;;  %779 = vmatpush1.msra.mxu1 %v395_v41 }
 0x42e   :  { %709 = vmatprep.subr.mxu0 %v386_v43  ;;  %780 = vmatprep.subr.mxu1 %v388_v44 }
 0x42f   :  { %710 = vmatpush1.msra.mxu0 %v385_v45  ;;  %781 = vmatpush1.msra.mxu1 %v387_v46 }
 0x430   :  { %711 = vmatprep.subr.mxu0 %v378_v47  ;;  %782 = vmatprep.subr.mxu1 %v380_v48 }
 0x431   :  { %712 = vmatpush1.msra.mxu0 %v377_v49  ;;  %783 = vmatpush1.msra.mxu1 %v379_v50 }
 0x432   :  { %713 = vmatprep.subr.mxu0 %v370_v51  ;;  %784 = vmatprep.subr.mxu1 %v372_v52 }
 0x433   :  { %714 = vmatpush1.msra.mxu0 %v369_v53  ;;  %785 = vmatpush1.msra.mxu1 %v371_v54  ;;  %v2788_v54 = vld [vmem:[#allocation12 + $0x20] sm:$0x3f] }
 0x434   :  { %715 = vmatprep.subr.mxu0 %v362_v55  ;;  %786 = vmatprep.subr.mxu1 %v364_v56  ;;  %v2790_v55 = vld [vmem:[#allocation12 + $0x30] sm:$0x3f] }
 0x435   :  { %716 = vmatpush1.msra.mxu0 %v361_v57  ;;  %787 = vmatpush1.msra.mxu1 %v363_v58 }
 0x436   :  { %717 = vmatprep.subr.mxu0 %v354_v59  ;;  %788 = vmatprep.subr.mxu1 %v356_v60  ;;  %v532_v60 = vrot.slane %v2788_v54, %v2704_v7 }
 0x437   :  { %718 = vmatpush1.msra.mxu0 %v353_v61  ;;  %789 = vmatpush1.msra.mxu1 %v355_v62  ;;  %v540_v61 = vrot.slane %v2790_v55, %v2704_v7 }
 0x438   :  { %719 = vmatprep.subr.mxu0 %v346_v63  ;;  %790 = vmatprep.subr.mxu1 %v348_v1 }
 0x439   :  { %720 = vmatpush1.msra.mxu0 %v345_v2  ;;  %791 = vmatpush1.msra.mxu1 %v347_v3 }
 0x43a   :  { %721 = vmatprep.subr.mxu0 %v338_v4  ;;  %792 = vmatprep.subr.mxu1 %v340_v6  ;;  %v2796_v6 = vld [vmem:[#allocation12 + $0x28] sm:$0x3f] }
 0x43b   :  { %722 = vmatpush1.msra.mxu0 %v337_v9  ;;  %755 = vmatprep.mubr.f32.mxu0 %v2578_v0 }
 0x43c   :  { %793 = vmatpush1.msra.mxu1 %v339_v10  ;;  %826 = vmatprep.mubr.f32.mxu1 %v2578_v0 }
 0x43d   :  { %2215 = vmatmul.mubr.msk.f32.vlgmr.msra.gmra.mxu0 %vm545_vm8, %v2738_v42  ;;  %2216 = vmatmul.mubr.msk.f32.vlgmr.msra.gmra.mxu1 %vm545_vm8, %v2738_v42 }
 0x43e   :  { %2291 = vmatprep.subr.mxu0 %v2578_v0  ;;  %2295 = vmatprep.mubr.msk.f32.mxu0 %vm2579_vm0, %v2578_v0 }
 0x43f   :  { %2292 = vmatpush3.xpose.msk.msra.mxu0 %vm152_vm1, %v150_v11  ;;  %2298 = vmatprep.subr.mxu1 %v2578_v0 }
 0x440   :  { %2293 = vmatprep.subr.mxu0 %v2578_v0  ;;  %2299 = vmatpush3.msk.msra.mxu1 %vm256_vm5, %v150_v11 }
 0x441   :  { %2300 = vmatprep.subr.mxu1 %v2578_v0  ;;  %2302 = vmatprep.mubr.msk.f32.mxu1 %vm2579_vm0, %v2578_v0 }
 0x442   :  { %2301 = vmatpush3.msra.mxu1 %v149_v12 }
 0x443   :  { %2294 = vmatpush3.xpose.msk.msra.mxu0 %vm152_vm1, %v149_v12 }
 0x444   :  { %2305 = vmatprep.subr.mxu0 %v2578_v0 }
 0x446   :  { %2296 = vmatmul.mubr.msk.f32.vlgmr.msra.gmra.mxu0 %vm152_vm1, %v1176_v13 }
 0x447   :  { %2313 = vmatprep.mubr.msk.f32.mxu0 %vm2579_vm0, %v2578_v0 }
 0x4ec   :  { %v615_v22 = vpop.f32.mrf.mxu0  ;;  %v686_v23 = vpop.f32.mrf.mxu1 }
 0x4ed   :  { %v616_v24 = vadd.f32 %v615_v22, %v516_v18  ;;  %v687_v25 = vadd.f32 %v686_v23, %v524_v19 }
 0x4ee   :  { %v617_v26 = vpop.f32.mrf.mxu0  ;;  %v688_v27 = vpop.f32.mrf.mxu1 }
 0x4ef   :  { %v834_v29 = vsel %vm833_vm10, %v616_v24, 0.0  ;;  %v848_v31 = vsel %vm833_vm10, %v687_v25, 0.0  ;;  %v618_v32 = vadd.f32 %v617_v26, %v520_v20  ;;  %v689_v33 = vadd.f32 %v688_v27, %v528_v21  ;;  %v2820_v26 = vld [vmem:[#allocation12 + $0x38] sm:$0x3f] }
 0x4f0   :  { %v835_v34 = vrot.slane %v834_v29, 4  ;;  %v849_v35 = vrot.slane %v848_v31, 4  ;;  %v536_v21 = vrot.slane %v2796_v6, %v2704_v7 }
 0x4f1   :  { %v841_v36 = vsel %vm833_vm10, %v618_v32, 0.0  ;;  %v855_v37 = vsel %vm833_vm10, %v689_v33, 0.0 }
 0x4f2   :  { %v836_v38 = vadd.f32 %v835_v34, %v834_v29  ;;  %v850_v39 = vadd.f32 %v849_v35, %v848_v31  ;;  %v842_v40 = vrot.slane %v841_v36, 4  ;;  %v856_v41 = vrot.slane %v855_v37, 4 }
 0x4f4   :  { %v837_v42 = vrot.slane %v836_v38, 2  ;;  %v851_v43 = vrot.slane %v850_v39, 2  ;;  %v843_v44 = vadd.f32 %v842_v40, %v841_v36  ;;  %v857_v45 = vadd.f32 %v856_v41, %v855_v37 }
 0x4f5   :  { %v544_v40 = vrot.slane %v2820_v26, %v2704_v7 }
 0x4f6   :  { %v838_v46 = vadd.f32 %v837_v42, %v836_v38  ;;  %v852_v47 = vadd.f32 %v851_v43, %v850_v39  ;;  %v844_v48 = vrot.slane %v843_v44, 2  ;;  %v858_v49 = vrot.slane %v857_v45, 2 }
 0x4f8   :  { %v839_v50 = vrot.slane %v838_v46, 1  ;;  %v853_v51 = vrot.slane %v852_v47, 1  ;;  %v845_v52 = vadd.f32 %v844_v48, %v843_v44  ;;  %v859_v53 = vadd.f32 %v858_v49, %v857_v45 }
 0x4fa   :  { %v840_v56 = vadd.f32 %v839_v50, %v838_v46  ;;  %v854_v57 = vadd.f32 %v853_v51, %v852_v47  ;;  %v846_v58 = vrot.slane %v845_v52, 1  ;;  %v860_v59 = vrot.slane %v859_v53, 1 }
 0x4fc   :  { %v890_v62 = vmul.f32 0.5, %v840_v56  ;;  %v892_v63 = vmul.f32 0.5, %v854_v57  ;;  %v847_v1 = vadd.f32 %v846_v58, %v845_v52  ;;  %v861_v2 = vadd.f32 %v860_v59, %v859_v53 }
 0x4fd   :  { %v757_v3 = vpop.f32.mrf.mxu0  ;;  %v828_v4 = vpop.f32.mrf.mxu1 }
 0x4fe   :  { %v2798_v9 = vsub.f32 %v616_v24, %v890_v62  ;;  %v2800_v10 = vsub.f32 %v687_v25, %v892_v63  ;;  %v891_v11 = vmul.f32 0.5, %v847_v1  ;;  %v893_v12 = vmul.f32 0.5, %v861_v2 }
 0x4ff   :  { %v2802_v13 = vadd.f32 %v757_v3, %v532_v60  ;;  %v2804_v18 = vadd.f32 %v828_v4, %v540_v61  ;;  %v759_v35 = vpop.f32.mrf.mxu0  ;;  %v830_v49 = vpop.f32.mrf.mxu1 }
 0x500   :  { %v906_v19 = vmul.f32 %v2798_v9, %v2798_v9  ;;  %v908_v20 = vmul.f32 %v2800_v10, %v2800_v10  ;;  %v2812_v22 = vsub.f32 %v618_v32, %v891_v11  ;;  %v2814_v23 = vsub.f32 %v689_v33, %v893_v12 }
 0x501   :  { %v862_v24 = vsel %vm833_vm10, %v2802_v13, 0.0  ;;  %v876_v25 = vsel %vm833_vm10, %v2804_v18, 0.0  ;;  %v2831_v44 = vadd.f32 %v759_v35, %v536_v21  ;;  %v2838_v2 = vadd.f32 %v830_v49, %v544_v40 }
 0x502   :  { %v914_v27 = vsel %vm833_vm10, %v906_v19, 0.0  ;;  %v928_v29 = vsel %vm833_vm10, %v908_v20, 0.0  ;;  %v863_v31 = vrot.slane %v862_v24, 4  ;;  %v877_v34 = vrot.slane %v876_v25, 4 }
 0x503   :  { %v915_v36 = vrot.slane %v914_v27, 4  ;;  %v929_v32 = vrot.slane %v928_v29, 4  ;;  %v907_v33 = vmul.f32 %v2812_v22, %v2812_v22  ;;  %v909_v37 = vmul.f32 %v2814_v23, %v2814_v23 }
 0x504   :  { %v864_v38 = vadd.f32 %v863_v31, %v862_v24  ;;  %v878_v39 = vadd.f32 %v877_v34, %v876_v25  ;;  %v869_v56 = vsel %vm833_vm10, %v2831_v44, 0.0  ;;  %v883_v24 = vsel %vm833_vm10, %v2838_v2, 0.0 }
 0x505   :  { %v916_v41 = vadd.f32 %v915_v36, %v914_v27  ;;  %v930_v42 = vadd.f32 %v929_v32, %v928_v29  ;;  %v921_v43 = vsel %vm833_vm10, %v907_v33, 0.0  ;;  %v935_v46 = vsel %vm833_vm10, %v909_v37, 0.0 }
 0x506   :  { %v922_v45 = vrot.slane %v921_v43, 4  ;;  %v865_v47 = vrot.slane %v864_v38, 2  ;;  %v879_v48 = vrot.slane %v878_v39, 2  ;;  %v2834_v50 = vpop.f32.mrf.mxu0  ;;  %v936_v53 = vrot.slane %v935_v46, 4 }
 0x507   :  { %v917_v51 = vrot.slane %v916_v41, 2  ;;  %v931_v52 = vrot.slane %v930_v42, 2  ;;  %v870_v60 = vrot.slane %v869_v56, 4  ;;  %v884_v32 = vrot.slane %v883_v24, 4 }
 0x508   :  { %v923_v57 = vadd.f32 %v922_v45, %v921_v43  ;;  %v866_v58 = vadd.f32 %v865_v47, %v864_v38  ;;  %v880_v59 = vadd.f32 %v879_v48, %v878_v39  ;;  %v2297_v61 = vpop.f32.mrf.mxu0  ;;  %v937_v1 = vadd.f32 %v936_v53, %v935_v46 }
 0x509   :  { %v918_v62 = vadd.f32 %v917_v51, %v916_v41  ;;  %v932_v63 = vadd.f32 %v931_v52, %v930_v42  ;;  %v871_v12 = vadd.f32 %v870_v60, %v869_v56  ;;  %v885_v43 = vadd.f32 %v884_v32, %v883_v24 }
 0x50a   :  { %v924_v3 = vrot.slane %v923_v57, 2  ;;  %v867_v4 = vrot.slane %v866_v58, 1  ;;  %v881_v11 = vrot.slane %v880_v59, 1  ;;  %v938_v21 = vrot.slane %v937_v1, 2 }
 0x50b   :  { %v919_v19 = vrot.slane %v918_v62, 1  ;;  %v933_v20 = vrot.slane %v932_v63, 1  ;;  %v872_v31 = vrot.slane %v871_v12, 2 }
 0x50c   :  { %v925_v25 = vadd.f32 %v924_v3, %v923_v57  ;;  %v868_v27 = vadd.f32 %v867_v4, %v866_v58  ;;  %v882_v29 = vadd.f32 %v881_v11, %v880_v59  ;;  %v939_v36 = vadd.f32 %v938_v21, %v937_v1 }
 0x50d   :  { %v920_v34 = vadd.f32 %v919_v19, %v918_v62  ;;  %v934_v35 = vadd.f32 %v933_v20, %v932_v63  ;;  %v873_v39 = vadd.f32 %v872_v31, %v871_v12  ;;  %v886_v58 = vrot.slane %v885_v43, 2 }
 0x50e   :  { %v926_v33 = vrot.slane %v925_v25, 1  ;;  %v894_v37 = vmul.f32 0.5, %v868_v27  ;;  %v896_v38 = vmul.f32 0.5, %v882_v29  ;;  %v940_v42 = vrot.slane %v939_v36, 1 }
 0x50f   :  { %v970_v40 = vmul.f32 0.5, %v920_v34  ;;  %v972_v41 = vmul.f32 0.5, %v934_v35  ;;  %v874_v48 = vrot.slane %v873_v39, 1  ;;  %v887_v4 = vadd.f32 %v886_v58, %v885_v43 }
 0x510   :  { %v927_v45 = vadd.f32 %v926_v33, %v925_v25  ;;  %v2843_v46 = vsub.f32 %v2802_v13, %v894_v37  ;;  %v2846_v47 = vsub.f32 %v2804_v18, %v896_v38  ;;  %v941_v52 = vadd.f32 %v940_v42, %v939_v36 }
 0x511   :  { %v1018_v49 = vadd.f32 1e-05, %v970_v40  ;;  %v1020_v51 = vadd.f32 1e-05, %v972_v41  ;;  %v875_v60 = vadd.f32 %v874_v48, %v873_v39  ;;  %v1259_v11 = vrot.slane %v2834_v50, %v2704_v7 }
 0x512   :  { %v971_v53 = vmul.f32 0.5, %v927_v45  ;;  %v910_v56 = vmul.f32 %v2843_v46, %v2843_v46  ;;  %v912_v57 = vmul.f32 %v2846_v47, %v2846_v47  ;;  %v973_v59 = vmul.f32 0.5, %v941_v52 }
 0x513   :  { %2338 = vrsqrt.f32 %v1018_v49  ;;  %v895_v3 = vmul.f32 0.5, %v875_v60  ;;  %v888_v21 = vrot.slane %v887_v4, 1  ;;  %v2861_v24 = vsel %vm232_vm3, %v1259_v11, -1e+30 }
 0x514   :  { %2340 = vrsqrt.f32 %v1020_v51  ;;  %v1019_v13 = vadd.f32 1e-05, %v971_v53  ;;  %v942_v18 = vsel %vm833_vm10, %v910_v56, 0.0  ;;  %v956_v61 = vsel %vm833_vm10, %v912_v57, 0.0 }
 0x515   :  { %v1021_v62 = vadd.f32 1e-05, %v973_v59  ;;  %v943_v63 = vrot.slane %v942_v18, 4  ;;  %v957_v1 = vrot.slane %v956_v61, 4  ;;  %v2857_v20 = vsub.f32 %v2831_v44, %v895_v3 }
 0x516   :  { %2342 = vrsqrt.f32 %v1019_v13  ;;  %v889_v31 = vadd.f32 %v888_v21, %v887_v4  ;;  %v1261_v7 = vsel %vm238_vm4, %v2861_v24, -inf  ;;  %v981_v50 = vrot.slane %v2768_v14, %v2731_v28 }
 0x517   :  { %2344 = vrsqrt.f32 %v1021_v62  ;;  %v944_v12 = vadd.f32 %v943_v63, %v942_v18  ;;  %v958_v19 = vadd.f32 %v957_v1, %v956_v61  ;;  %v911_v29 = vmul.f32 %v2857_v20, %v2857_v20  ;;  %1262 = vmax.xlane.f32.xlu1 %v1261_v7 }
 0x518   :  { %v989_v36 = vrot.slane %v2770_v15, %v2731_v28  ;;  %v897_v33 = vmul.f32 0.5, %v889_v31  ;;  %v985_v37 = vrot.slane %v2772_v16, %v2731_v28  ;;  %v1045_v40 = vrot.slane %v2768_v14, %v2735_v30 }
 0x519   :  { %v945_v25 = vrot.slane %v944_v12, 2  ;;  %v959_v27 = vrot.slane %v958_v19, 2  ;;  %v949_v35 = vsel %vm833_vm10, %v911_v29, 0.0  ;;  %v993_v41 = vrot.slane %v2774_v17, %v2731_v28 }
 0x51a   :  { %v950_v32 = vrot.slane %v949_v35, 4  ;;  %v2879_v43 = vsub.f32 %v2838_v2, %v897_v33  ;;  %v1010_v45 = vmul.f32 %v981_v50, %v2798_v9  ;;  %v1053_v48 = vrot.slane %v2770_v15, %v2735_v30 }
 0x51b   :  { %v946_v34 = vadd.f32 %v945_v25, %v944_v12  ;;  %v960_v44 = vadd.f32 %v959_v27, %v958_v19  ;;  %v1012_v53 = vmul.f32 %v989_v36, %v2800_v10  ;;  %v1049_v14 = vrot.slane %v2772_v16, %v2735_v30 }
 0x51c   :  { %v951_v42 = vadd.f32 %v950_v32, %v949_v35  ;;  %v913_v57 = vmul.f32 %v2879_v43, %v2879_v43  ;;  %v1057_v9 = vrot.slane %v2774_v17, %v2735_v30  ;;  %v1011_v13 = vmul.f32 %v985_v37, %v2812_v22 }
 0x51d   :  { %v947_v38 = vrot.slane %v946_v34, 1  ;;  %v961_v39 = vrot.slane %v960_v44, 1  ;;  %v1013_v16 = vmul.f32 %v993_v41, %v2814_v23  ;;  %v2580_v41 = vmov 1983009808  }
 0x51e   :  { %v952_v56 = vrot.slane %v951_v42, 2  ;;  %v963_v10 = vsel %vm833_vm10, %v913_v57, 0.0 }
 0x51f   :  { %v948_v49 = vadd.f32 %v947_v38, %v946_v34  ;;  %v962_v51 = vadd.f32 %v961_v39, %v960_v44  ;;  %v964_v1 = vrot.slane %v963_v10, 4  ;;  %v997_v38 = vrot.slane %v2788_v54, %v2731_v28 }
 0x520   :  { %v2339_v52 = vpop.eup %2338  ;;  %v953_v18 = vadd.f32 %v952_v56, %v951_v42  ;;  %v1141_v42 = vunpack.c.l.s4 %v2580_v41 }
 0x521   :  { %v2341_v58 = vpop.eup %2340  ;;  %v1034_v2 = vmul.f32 %v2339_v52, %v1010_v45  ;;  %v974_v59 = vmul.f32 0.5, %v948_v49  ;;  %v976_v60 = vmul.f32 0.5, %v962_v51  ;;  %v965_v7 = vadd.f32 %v964_v1, %v963_v10 }
 0x522   :  { %v1036_v15 = vmul.f32 %v2341_v58, %v1012_v53  ;;  %v954_v12 = vrot.slane %v953_v18, 1  ;;  %v1014_v45 = vmul.f32 %v997_v38, %v2843_v46  ;;  %v1005_v49 = vrot.slane %v2790_v55, %v2731_v28 }
 0x523   :  { %v2343_v61 = vpop.eup %2342  ;;  %v2893_v62 = vadd.f32 %v1045_v40, %v1034_v2  ;;  %v1022_v63 = vadd.f32 1e-05, %v974_v59  ;;  %v1024_v17 = vadd.f32 1e-05, %v976_v60  ;;  %v966_v36 = vrot.slane %v965_v7, 2 }
 0x524   :  { %v2345_v3 = vpop.eup %2344  ;;  %v2896_v4 = vadd.f32 %v1053_v48, %v1036_v15  ;;  %v1035_v11 = vmul.f32 %v2343_v61, %v1011_v13  ;;  %v955_v31 = vadd.f32 %v954_v12, %v953_v18  ;;  %v1061_v53 = vrot.slane %v2788_v54, %v2735_v30 }
 0x525   :  { %v1090_v19 = vmin.f32 %v2893_v62, 0.0  ;;  %v1037_v21 = vmul.f32 %v2345_v3, %v1013_v16  ;;  %2346 = vrsqrt.f32 %v1022_v63  ;;  %v967_v37 = vadd.f32 %v966_v36, %v965_v7 }
 0x526   :  { %v1092_v22 = vmin.f32 %v2896_v4, 0.0  ;;  %v1075_v25 = vadd.f32 %v1049_v14, %v1035_v11  ;;  %2348 = vrsqrt.f32 %v1024_v17  ;;  %v975_v44 = vmul.f32 0.5, %v955_v31 }
 0x527   :  { %v1098_v27 = vmul.f32 1.442695, %v1090_v19  ;;  %v1077_v29 = vadd.f32 %v1057_v9, %v1037_v21  ;;  %v968_v39 = vrot.slane %v967_v37, 1  ;;  %v1142_v57 = vunpack.c.0.s8 %v1141_v42 }
 0x528   :  { %v1102_v23 = vmul.f32 1.442695, %v1092_v22  ;;  %v1091_v50 = vmin.f32 %v1075_v25, 0.0  ;;  %v1023_v33 = vadd.f32 1e-05, %v975_v44  ;;  %v1016_v2 = vmul.f32 %v1005_v49, %v2846_v47 }
 0x529   :  { %2350 = vpow2.f32 %v1098_v27  ;;  %v1093_v34 = vmin.f32 %v1077_v29, 0.0  ;;  %v969_v40 = vadd.f32 %v968_v39, %v967_v37  ;;  %v1001_v9 = vrot.slane %v2796_v6, %v2731_v28 }
 0x52a   :  { %2352 = vpow2.f32 %v1102_v23  ;;  %v1100_v35 = vmul.f32 1.442695, %v1091_v50  ;;  %v1069_v13 = vrot.slane %v2790_v55, %v2735_v30  ;;  %v2913_v54 = vsub.s32 %v1142_v57, %v2697_v5 }
 0x52b   :  { %v1104_v32 = vmul.f32 1.442695, %v1093_v34  ;;  %v977_v51 = vmul.f32 0.5, %v969_v40  ;;  %v1065_v61 = vrot.slane %v2796_v6, %v2735_v30  ;;  %vm1082_vm11 = vcmp.gt.f32.partialorder %v2893_v62, 0.0 }
 0x52c   :  { %2354 = vpow2.f32 %v1100_v35  ;;  %vm1084_vm12 = vcmp.gt.f32.partialorder %v2896_v4, 0.0  ;;  %v1015_v63 = vmul.f32 %v1001_v9, %v2857_v20  ;;  %vm1083_vm13 = vcmp.gt.f32.partialorder %v1075_v25, 0.0 }
 0x52d   :  { %2356 = vpow2.f32 %v1104_v32  ;;  %v1025_v14 = vadd.f32 1e-05, %v977_v51  ;;  %vm1085_vm14 = vcmp.gt.f32.partialorder %v1077_v29, 0.0  ;;  %v1009_v7 = vrot.slane %v2820_v26, %v2731_v28 }
 0x52e   :  { %2358 = vrsqrt.f32 %v1023_v33 }
 0x52f   :  { %2360 = vrsqrt.f32 %v1025_v14  ;;  %v1017_v35 = vmul.f32 %v1009_v7, %v2879_v43  ;;  %v1386_v7 = vld [vmem:[#allocation9 + $0x108] sm:$0xff] }
 0x532   :  { %v2347_v48 = vpop.eup %2346 }
 0x533   :  { %v1038_v52 = vmul.f32 %v2347_v48, %v1014_v45  ;;  %v2349_v56 = vpop.eup %2348 }
 0x534   :  { %v1040_v15 = vmul.f32 %v2349_v56, %v1016_v2 }
 0x535   :  { %v1078_v59 = vadd.f32 %v1061_v53, %v1038_v52 }
 0x536   :  { %v2351_v58 = vpop.eup %2350  ;;  %v1080_v12 = vadd.f32 %v1069_v13, %v1040_v15  ;;  %v1352_v15 = vld [vmem:[#allocation6 + $0x18] sm:$0xff]  ;;  %v1351_v13 = vld [vmem:[#allocation6 + $0x10] sm:$0xff] }
 0x537   :  { %v2353_v46 = vpop.eup %2352  ;;  %v2217_v60 = vadd.f32 -1.0, %v2351_v58  ;;  %v1094_v3 = vmin.f32 %v1078_v59, 0.0  ;;  %vm1086_vm0 = vcmp.gt.f32.partialorder %v1078_v59, 0.0  ;;  %2306 = vmatpush3.msra.mxu0 %v1352_v15 }
 0x538   :  { %v2219_v10 = vadd.f32 -1.0, %v2353_v46  ;;  %v1096_v34 = vmin.f32 %v1080_v12, 0.0  ;;  %vm1088_vm2 = vcmp.gt.f32.partialorder %v1080_v12, 0.0  ;;  %2307 = vmatprep.subr.mxu0 %v2578_v0 }
 0x539   :  { %v2355_v18 = vpop.eup %2354  ;;  %v1122_v11 = vsel %vm1082_vm11, %v2893_v62, %v2217_v60  ;;  %v1106_v23 = vmul.f32 1.442695, %v1094_v3  ;;  %2308 = vmatpush3.msra.mxu0 %v1351_v13  ;;  %v1409_v3 = vld [vmem:[#allocation9 + $0x1c0] sm:$0xff] }
 0x53a   :  { %v2357_v47 = vpop.eup %2356  ;;  %v2218_v16 = vadd.f32 -1.0, %v2355_v18  ;;  %v1124_v6 = vsel %vm1084_vm12, %v2896_v4, %v2219_v10  ;;  %v1073_v4 = vrot.slane %v2820_v26, %v2735_v30  ;;  %v1110_v28 = vmul.f32 1.442695, %v1096_v34  ;;  %v1350_v18 = vld [vmem:[#allocation6 + $0x8] sm:$0xff]  ;;  %2309 = vmatprep.subr.mxu0 %v2578_v0 }
 0x53b   :  { %v2359_v1 = vpop.eup %2358  ;;  %v2220_v55 = vadd.f32 -1.0, %v2357_v47  ;;  %2362 = vpow2.f32 %v1106_v23  ;;  %2310 = vmatpush3.msra.mxu0 %v1350_v18  ;;  %v1349_v47 = vld [vmem:[#allocation6] sm:$0xff]  ;;  %v1378_v34 = vld [vmem:[#allocation9 + $0xc8] sm:$0xff] }
 0x53c   :  { %v1123_v17 = vsel %vm1083_vm13, %v1075_v25, %v2218_v16  ;;  %v1039_v19 = vmul.f32 %v2359_v1, %v1015_v63  ;;  %2311 = vmatprep.subr.mxu0 %v2578_v0  ;;  %v1410_v1 = vld [vmem:[#allocation9 + $0x1c8] sm:$0xff]  ;;  %v1385_v23 = vld [vmem:[#allocation9 + $0x100] sm:$0xff] }
 0x53d   :  { %v1138_v21 = vcombine.low %v1122_v11, %v1123_v17  ;;  %v1125_v22 = vsel %vm1085_vm14, %v1077_v29, %v2220_v55  ;;  %v2361_v29 = vpop.eup %2360  ;;  %2312 = vmatpush3.msra.mxu0 %v1349_v47  ;;  %v1412_v55 = vld [vmem:[#allocation9 + $0x1d8] sm:$0xff]  ;;  %1582 = vmatprep.subr.mxu1 %v1410_v1  ;;  %v1411_v11 = vld [vmem:[#allocation9 + $0x1d0] sm:$0xff]  ;;  %v1402_v17 = vld [vmem:[#allocation9 + $0x188] sm:$0xff]  ;;  %v2958_v1 = vsub.s32 5, %v2697_v5 }
 0x53e   :  { %v1139_v27 = vcombine.low %v1124_v6, %v1125_v22  ;;  %v1079_v31 = vadd.f32 %v1065_v61, %v1039_v19  ;;  %v1041_v36 = vmul.f32 %v2361_v29, %v1017_v35  ;;  %1653 = vmatprep.subr.mxu0 %v1412_v55  ;;  %v1401_v19 = vld [vmem:[#allocation9 + $0x180] sm:$0xff]  ;;  %v1403_v6 = vld [vmem:[#allocation9 + $0x190] sm:$0xff]  ;;  %v1396_v22 = vld [vmem:[#allocation9 + $0x158] sm:$0xff] }
 0x53f   :  { %v1146_v20 = vrot.slane %v1138_v21, %v2913_v54  ;;  %v1394_v21 = vld [vmem:[#allocation9 + $0x148] sm:$0xff]  ;;  %v1369_v29 = vld [vmem:[#allocation9 + $0x80] sm:$0xff] }
 0x540   :  { %v1153_v50 = vrot.slane %v1139_v27, %v2913_v54  ;;  %v1095_v44 = vmin.f32 %v1079_v31, 0.0  ;;  %v1081_v32 = vadd.f32 %v1073_v4, %v1041_v36  ;;  %vm1087_vm15 = vcmp.gt.f32.partialorder %v1079_v31, 0.0  ;;  %v1393_v27 = vld [vmem:[#allocation9 + $0x140] sm:$0xff]  ;;  %v1370_v35 = vld [vmem:[#allocation9 + $0x88] sm:$0xff]  ;;  %v1372_v4 = vld [vmem:[#allocation9 + $0x98] sm:$0xff] }
 0x541   :  { %v1362_v36 = vld [vmem:[#allocation9 + $0x48] sm:$0xff] }
 0x542   :  { %v1154_v62 = vcombine.low %v1146_v20, %v1153_v50  ;;  %v1108_v25 = vmul.f32 1.442695, %v1095_v44  ;;  %v1097_v33 = vmin.f32 %v1081_v32, 0.0  ;;  %vm1089_vm3 = vcmp.gt.f32.partialorder %v1081_v32, 0.0  ;;  %v1388_v20 = vld [vmem:[#allocation9 + $0x118] sm:$0xff]  ;;  %v1387_v50 = vld [vmem:[#allocation9 + $0x110] sm:$0xff] }
 0x543   :  { %v1380_v44 = vld [vmem:[#allocation9 + $0xd8] sm:$0xff] }
 0x544   :  { %1174 = vst [vmem:[%s3139_s10] sm:$0xff] %v1154_v62  ;;  %2364 = vpow2.f32 %v1108_v25  ;;  %v1112_v37 = vmul.f32 1.442695, %v1097_v33  ;;  %v1377_v62 = vld [vmem:[#allocation9 + $0xc0] sm:$0xff]  ;;  %v1379_v25 = vld [vmem:[#allocation9 + $0xd0] sm:$0xff] }
 0x545   :  { %2366 = vpow2.f32 %v1110_v28  ;;  %v1371_v28 = vld [vmem:[#allocation9 + $0x90] sm:$0xff]  ;;  %v1361_v33 = vld [vmem:[#allocation9 + $0x40] sm:$0xff] }
 0x546   :  { %2368 = vpow2.f32 %v1112_v37  ;;  %v1363_v37 = vld [vmem:[#allocation9 + $0x50] sm:$0xff] }
 0x548   :  { %v2363_v38 = vpop.eup %2362 }
 0x549   :  { %v2221_v40 = vadd.f32 -1.0, %v2363_v38  ;;  %v1354_v38 = vld [vmem:[#allocation9 + $0x8] sm:$0xff] }
 0x54b   :  { %v1126_v26 = vsel %vm1086_vm0, %v1078_v59, %v2221_v40  ;;  %v1355_v40 = vld [vmem:[#allocation9 + $0x10] sm:$0xff] }
 0x551   :  { %v2365_v39 = vpop.eup %2364 }
 0x552   :  { %v2222_v43 = vadd.f32 -1.0, %v2365_v39  ;;  %v2367_v41 = vpop.eup %2366  ;;  %v1356_v39 = vld [vmem:[#allocation9 + $0x18] sm:$0xff] }
 0x553   :  { %v2223_v42 = vadd.f32 -1.0, %v2367_v41  ;;  %v2369_v45 = vpop.eup %2368  ;;  %v1414_v41 = vld [vmem:[#allocation9 + $0x1e8] sm:$0xff] }
 0x554   :  { %v1127_v30 = vsel %vm1087_vm15, %v1079_v31, %v2222_v43  ;;  %v2224_v49 = vadd.f32 -1.0, %v2369_v45  ;;  %v1395_v31 = vld [vmem:[#allocation9 + $0x150] sm:$0xff]  ;;  %v1353_v43 = vld [vmem:[#allocation9] sm:$0xff] }
 0x555   :  { %v1155_v48 = vcombine.low %v1126_v26, %v1127_v30  ;;  %v1128_v51 = vsel %vm1088_vm2, %v1080_v12, %v2223_v42  ;;  %v1404_v12 = vld [vmem:[#allocation9 + $0x198] sm:$0xff]  ;;  %v2948_v26 = vsub.s32 3, %v2697_v5  ;;  %v2410_v42 = vld [vmem:[#allocation10] sm:$0x3f] }
 0x556   :  { %v1129_v52 = vsel %vm1089_vm3, %v1081_v32, %v2224_v49  ;;  %v1364_v32 = vld [vmem:[#allocation9 + $0x58] sm:$0xff] }
 0x557   :  { %v1163_v53 = vrot.slane %v1155_v48, %v2913_v54  ;;  %v1156_v14 = vcombine.low %v1128_v51, %v1129_v52  ;;  %v1416_v30 = vld [vmem:[#allocation9 + $0x1f8] sm:$0xff]  ;;  %v1420_v45 = vrot.slane %v2410_v42, %v2948_v26 }
 0x559   :  { %v1170_v56 = vrot.slane %v1156_v14, %v2913_v54 }
 0x55b   :  { %v1171_v57 = vcombine.low %v1163_v53, %v1170_v56 }
 0x55d   :  { %1175 = vst [vmem:[%s3139_s10 + $0x8] sm:$0xff] %v1171_v57 }
 0x5a0   :  { %v1263_v58 = vpop.xlane.xlu1 %1262 }
 0x5a1   :  { %v1264_v2 = vsub.f32 %v2861_v24, %v1263_v58 }
 0x5a3   :  { %v1265_v9 = vmul.f32 1.442695, %v1264_v2 }
 0x5a5   :  { %2370 = vpow2.f32 %v1265_v9 }
 0x5b2   :  { %v2371_v46 = vpop.eup %2370 }
 0x5b3   :  { %v1267_v59 = vmul.f32 %v2371_v46, %v2707_v8 }
 0x5b5   :  { %v1268_v60 = vsel %vm238_vm4, %v1267_v59, 0.0 }
 0x5b6   :  { %1269 = vadd.xlane.f32.xlu1 %v1268_v60 }
 0x63f   :  { %v1270_v24 = vpop.xlane.xlu1 %1269 }
 0x640   :  { %v1271_v10 = vmax.f32 %v1270_v24, 1e-30 }
 0x642   :  { %2372 = vrcp.f32 %v1271_v10 }
 0x64f   :  { %v2373_v61 = vpop.eup %2372 }
 0x650   :  { %v1273_v8 = vmul.f32 %v2373_v61, %v1267_v59 }
 0x652   :  { %2303 = vmatmul.mubr.msk.f32.vlgmr.msra.gmra.mxu1 %vm252_vm6, %v1273_v8 }
 0x653   :  { %1630 = vmatprep.mubr.f32.mxu1 %v2578_v0  ;;  %1583 = vmatpush1.msra.mxu1 %v1409_v3  ;;  %v1523_v3 = vrot.slane %v2410_v42, %v2958_v1 }
 0x654   :  { %1584 = vmatprep.subr.mxu1 %v1402_v17 }
 0x655   :  { %1585 = vmatpush1.msra.mxu1 %v1401_v19 }
 0x656   :  { %1586 = vmatprep.subr.mxu1 %v1394_v21 }
 0x657   :  { %1587 = vmatpush1.msra.mxu1 %v1393_v27  ;;  %v1413_v27 = vld [vmem:[#allocation9 + $0x1e0] sm:$0xff] }
 0x658   :  { %1588 = vmatprep.subr.mxu1 %v1386_v7 }
 0x659   :  { %1589 = vmatpush1.msra.mxu1 %v1385_v23  ;;  %v1408_v23 = vld [vmem:[#allocation9 + $0x1b8] sm:$0xff] }
 0x65a   :  { %1590 = vmatprep.subr.mxu1 %v1378_v34  ;;  %v1398_v34 = vld [vmem:[#allocation9 + $0x168] sm:$0xff] }
 0x65b   :  { %1591 = vmatpush1.msra.mxu1 %v1377_v62  ;;  %v1397_v62 = vld [vmem:[#allocation9 + $0x160] sm:$0xff] }
 0x65c   :  { %1592 = vmatprep.subr.mxu1 %v1370_v35  ;;  %v1390_v35 = vld [vmem:[#allocation9 + $0x128] sm:$0xff] }
 0x65d   :  { %1593 = vmatpush1.msra.mxu1 %v1369_v29  ;;  %v1389_v29 = vld [vmem:[#allocation9 + $0x120] sm:$0xff] }
 0x65e   :  { %1594 = vmatprep.subr.mxu1 %v1362_v36  ;;  %v1382_v36 = vld [vmem:[#allocation9 + $0xe8] sm:$0xff] }
 0x65f   :  { %1595 = vmatpush1.msra.mxu1 %v1361_v33  ;;  %v1381_v33 = vld [vmem:[#allocation9 + $0xe0] sm:$0xff] }
 0x660   :  { %1596 = vmatprep.subr.mxu1 %v1354_v38  ;;  %v1374_v38 = vld [vmem:[#allocation9 + $0xa8] sm:$0xff] }
 0x661   :  { %1597 = vmatpush1.msra.mxu1 %v1353_v43  ;;  %v1373_v43 = vld [vmem:[#allocation9 + $0xa0] sm:$0xff] }
 0x662   :  { %1724 = vmatprep.subr.mxu1 %v1414_v41  ;;  %v1366_v41 = vld [vmem:[#allocation9 + $0x68] sm:$0xff] }
 0x712   :  { %v1345_v16 = vpop.f32.mrf.mxu1 }
 0x713   :  { %2314 = vmatmul.mubr.msk.f32.vlgmr.msra.gmra.mxu0 %vm152_vm1, %v1345_v16  ;;  %v2954_v16 = vsub.s32 4, %v2697_v5  ;;  %v1405_v5 = vld [vmem:[#allocation9 + $0x1a0] sm:$0xff] }
 0x714   :  { %v2304_v63 = vpop.f32.mrf.mxu1  ;;  %1701 = vmatprep.mubr.f32.mxu0 %v2578_v0  ;;  %1654 = vmatpush1.msra.mxu0 %v1411_v11 }
 0x715   :  { %1655 = vmatprep.subr.mxu0 %v1404_v12  ;;  %v1515_v63 = vrot.slane %v2410_v42, %v2954_v16  ;;  %v1365_v42 = vld [vmem:[#allocation9 + $0x60] sm:$0xff] }
 0x716   :  { %1656 = vmatpush1.msra.mxu0 %v1403_v6 }
 0x717   :  { %1657 = vmatprep.subr.mxu0 %v1396_v22 }
 0x718   :  { %1658 = vmatpush1.msra.mxu0 %v1395_v31  ;;  %v1415_v31 = vld [vmem:[#allocation9 + $0x1f0] sm:$0xff] }
 0x719   :  { %1659 = vmatprep.subr.mxu0 %v1388_v20  ;;  %v1406_v20 = vld [vmem:[#allocation9 + $0x1a8] sm:$0xff] }
 0x71a   :  { %1660 = vmatpush1.msra.mxu0 %v1387_v50  ;;  %v1407_v50 = vld [vmem:[#allocation9 + $0x1b0] sm:$0xff] }
 0x71b   :  { %1661 = vmatprep.subr.mxu0 %v1380_v44  ;;  %v1400_v44 = vld [vmem:[#allocation9 + $0x178] sm:$0xff] }
 0x71c   :  { %1662 = vmatpush1.msra.mxu0 %v1379_v25  ;;  %v1399_v25 = vld [vmem:[#allocation9 + $0x170] sm:$0xff] }
 0x71d   :  { %1663 = vmatprep.subr.mxu0 %v1372_v4  ;;  %v1392_v4 = vld [vmem:[#allocation9 + $0x138] sm:$0xff] }
 0x71e   :  { %1664 = vmatpush1.msra.mxu0 %v1371_v28  ;;  %v1391_v28 = vld [vmem:[#allocation9 + $0x130] sm:$0xff] }
 0x71f   :  { %1665 = vmatprep.subr.mxu0 %v1364_v32  ;;  %v1384_v32 = vld [vmem:[#allocation9 + $0xf8] sm:$0xff] }
 0x720   :  { %1666 = vmatpush1.msra.mxu0 %v1363_v37  ;;  %v1383_v37 = vld [vmem:[#allocation9 + $0xf0] sm:$0xff] }
 0x721   :  { %1667 = vmatprep.subr.mxu0 %v1356_v39  ;;  %v1376_v39 = vld [vmem:[#allocation9 + $0xb8] sm:$0xff] }
 0x722   :  { %1668 = vmatpush1.msra.mxu0 %v1355_v40  ;;  %v1375_v40 = vld [vmem:[#allocation9 + $0xb0] sm:$0xff] }
 0x723   :  { %1795 = vmatprep.subr.mxu0 %v1416_v30  ;;  %v1368_v30 = vld [vmem:[#allocation9 + $0x78] sm:$0xff] }
 0x7d3   :  { %v1490_v48 = vpop.f32.mrf.mxu0 }
 0x7d4   :  { %v1491_v49 = vadd.f32 %v1490_v48, %v1420_v45  ;;  %v1367_v45 = vld [vmem:[#allocation9 + $0x70] sm:$0xff]  ;;  %v1358_v48 = vld [vmem:[#allocation9 + $0x28] sm:$0xff] }
 0x7d5   :  { %v2315_v51 = vpop.f32.mrf.mxu0 }
 0x7d6   :  { %v1494_v52 = vsel %vm474_vm7, %v1491_v49, 0.0  ;;  %v1357_v51 = vld [vmem:[#allocation9 + $0x20] sm:$0xff] }
 0x7d7   :  { %v1495_v53 = vrot.slane %v1494_v52, 4 }
 0x7d9   :  { %v1496_v14 = vadd.f32 %v1495_v53, %v1494_v52  ;;  %v1359_v52 = vld [vmem:[#allocation9 + $0x30] sm:$0xff]  ;;  %v2973_v53 = vld [vmem:[#allocation12] sm:$0x3f] }
 0x7db   :  { %v1497_v56 = vrot.slane %v1496_v14, 2 }
 0x7dd   :  { %v1498_v57 = vadd.f32 %v1497_v56, %v1496_v14  ;;  %v1534_v14 = vrot.slane %v2973_v53, %v2948_v26  ;;  %v2977_v56 = vld [vmem:[#allocation12 + $0x10] sm:$0x3f] }
 0x7df   :  { %v1499_v58 = vrot.slane %v1498_v57, 1 }
 0x7e1   :  { %v1500_v2 = vadd.f32 %v1499_v58, %v1498_v57  ;;  %v1542_v57 = vrot.slane %v2977_v56, %v2948_v26  ;;  %v2981_v58 = vld [vmem:[#allocation12 + $0x8] sm:$0x3f] }
 0x7e3   :  { %v1501_v9 = vmul.f32 0.5, %v1500_v2  ;;  %v2985_v2 = vld [vmem:[#allocation12 + $0x18] sm:$0x3f] }
 0x7e5   :  { %v1502_v46 = vsub.f32 %v1491_v49, %v1501_v9  ;;  %v1360_v49 = vld [vmem:[#allocation9 + $0x38] sm:$0xff]  ;;  %v1546_v9 = vrot.slane %v2985_v2, %v2948_v26 }
 0x7e7   :  { %v1503_v59 = vmul.f32 %v1502_v46, %v1502_v46  ;;  %v1516_v55 = vmul.f32 %v1515_v63, %v1502_v46 }
 0x7e9   :  { %v1504_v60 = vsel %vm474_vm7, %v1503_v59, 0.0 }
 0x7ea   :  { %v1505_v15 = vrot.slane %v1504_v60, 4 }
 0x7ec   :  { %v1506_v13 = vadd.f32 %v1505_v15, %v1504_v60 }
 0x7ee   :  { %v1507_v18 = vrot.slane %v1506_v13, 2 }
 0x7f0   :  { %v1508_v24 = vadd.f32 %v1507_v18, %v1506_v13 }
 0x7f2   :  { %v1509_v10 = vrot.slane %v1508_v24, 1 }
 0x7f4   :  { %v1510_v61 = vadd.f32 %v1509_v10, %v1508_v24 }
 0x7f6   :  { %v1511_v8 = vmul.f32 0.5, %v1510_v61 }
 0x7f8   :  { %v1517_v47 = vadd.f32 1e-05, %v1511_v8 }
 0x7fa   :  { %2374 = vrsqrt.f32 %v1517_v47 }
 0x807   :  { %v2375_v11 = vpop.eup %2374 }
 0x808   :  { %v1519_v17 = vmul.f32 %v2375_v11, %v1516_v55 }
 0x80a   :  { %v1524_v12 = vadd.f32 %v1523_v3, %v1519_v17 }
 0x80c   :  { %v1526_v19 = vmin.f32 %v1524_v12, 0.0  ;;  %vm1525_vm1 = vcmp.gt.f32.partialorder %v1524_v12, 0.0 }
 0x80e   :  { %v1527_v6 = vmul.f32 1.442695, %v1526_v19 }
 0x810   :  { %2376 = vpow2.f32 %v1527_v6 }
 0x81d   :  { %v2377_v21 = vpop.eup %2376 }
 0x81e   :  { %v2231_v22 = vadd.f32 -1.0, %v2377_v21 }
 0x820   :  { %v2961_v7 = vsel %vm1525_vm1, %v1524_v12, %v2231_v22 }
 0x821   :  { %2232 = vmatmul.mubr.msk.f32.vlgmr.msra.gmra.mxu1 %vm545_vm8, %v2961_v7  ;;  %2233 = vmatmul.mubr.msk.f32.vlgmr.msra.gmra.mxu0 %vm545_vm8, %v2961_v7 }
 0x822   :  { %1725 = vmatpush1.msra.mxu1 %v1413_v27  ;;  %1796 = vmatpush1.msra.mxu0 %v1415_v31 }
 0x823   :  { %1726 = vmatprep.subr.mxu1 %v1406_v20  ;;  %1797 = vmatprep.subr.mxu0 %v1408_v23 }
 0x824   :  { %1727 = vmatpush1.msra.mxu1 %v1405_v5  ;;  %1798 = vmatpush1.msra.mxu0 %v1407_v50 }
 0x825   :  { %1728 = vmatprep.subr.mxu1 %v1398_v34  ;;  %1799 = vmatprep.subr.mxu0 %v1400_v44 }
 0x826   :  { %1729 = vmatpush1.msra.mxu1 %v1397_v62  ;;  %1800 = vmatpush1.msra.mxu0 %v1399_v25 }
 0x827   :  { %1730 = vmatprep.subr.mxu1 %v1390_v35  ;;  %1801 = vmatprep.subr.mxu0 %v1392_v4 }
 0x828   :  { %1731 = vmatpush1.msra.mxu1 %v1389_v29  ;;  %1802 = vmatpush1.msra.mxu0 %v1391_v28  ;;  %v2993_v29 = vld [vmem:[#allocation12 + $0x20] sm:$0x3f] }
 0x829   :  { %1732 = vmatprep.subr.mxu1 %v1382_v36  ;;  %1803 = vmatprep.subr.mxu0 %v1384_v32  ;;  %v1550_v28 = vrot.slane %v2993_v29, %v2948_v26  ;;  %v2997_v36 = vld [vmem:[#allocation12 + $0x30] sm:$0x3f] }
 0x82a   :  { %1733 = vmatpush1.msra.mxu1 %v1381_v33  ;;  %1804 = vmatpush1.msra.mxu0 %v1383_v37  ;;  %v1558_v32 = vrot.slane %v2997_v36, %v2948_v26 }
 0x82b   :  { %1734 = vmatprep.subr.mxu1 %v1374_v38  ;;  %1805 = vmatprep.subr.mxu0 %v1376_v39 }
 0x82c   :  { %1735 = vmatpush1.msra.mxu1 %v1373_v43  ;;  %1806 = vmatpush1.msra.mxu0 %v1375_v40 }
 0x82d   :  { %1736 = vmatprep.subr.mxu1 %v1366_v41  ;;  %1807 = vmatprep.subr.mxu0 %v1368_v30 }
 0x82e   :  { %1737 = vmatpush1.msra.mxu1 %v1365_v42  ;;  %1808 = vmatpush1.msra.mxu0 %v1367_v45 }
 0x82f   :  { %1738 = vmatprep.subr.mxu1 %v1358_v48  ;;  %1809 = vmatprep.subr.mxu0 %v1360_v49 }
 0x830   :  { %1739 = vmatpush1.msra.mxu1 %v1357_v51  ;;  %1772 = vmatprep.mubr.f32.mxu1 %v2578_v0 }
 0x831   :  { %1810 = vmatpush1.msra.mxu0 %v1359_v52  ;;  %1843 = vmatprep.mubr.f32.mxu0 %v2578_v0  ;;  %v1538_v0 = vrot.slane %v2981_v58, %v2948_v26 }
 0x832   :  { %2234 = vmatmul.mubr.msk.f32.vlgmr.msra.gmra.mxu1 %vm545_vm8, %v2961_v7  ;;  %2235 = vmatmul.mubr.msk.f32.vlgmr.msra.gmra.mxu0 %vm545_vm8, %v2961_v7 }
 0x8e1   :  { %v1632_v46 = vpop.f32.mrf.mxu1  ;;  %v1703_v59 = vpop.f32.mrf.mxu0 }
 0x8e2   :  { %v1633_v60 = vadd.f32 %v1632_v46, %v1534_v14  ;;  %v1704_v15 = vadd.f32 %v1703_v59, %v1542_v57  ;;  %v3013_v14 = vld [vmem:[#allocation12 + $0x28] sm:$0x3f] }
 0x8e3   :  { %v1634_v13 = vpop.f32.mrf.mxu1  ;;  %v1705_v18 = vpop.f32.mrf.mxu0  ;;  %v1554_v57 = vrot.slane %v3013_v14, %v2948_v26 }
 0x8e4   :  { %v1850_v24 = vsel %vm833_vm10, %v1633_v60, 0.0  ;;  %v1864_v10 = vsel %vm833_vm10, %v1704_v15, 0.0  ;;  %v1635_v61 = vadd.f32 %v1634_v13, %v1538_v0  ;;  %v1706_v8 = vadd.f32 %v1705_v18, %v1546_v9 }
 0x8e5   :  { %v1851_v47 = vrot.slane %v1850_v24, 4  ;;  %v1865_v63 = vrot.slane %v1864_v10, 4 }
 0x8e6   :  { %v1857_v55 = vsel %vm833_vm10, %v1635_v61, 0.0  ;;  %v1871_v3 = vsel %vm833_vm10, %v1706_v8, 0.0 }
 0x8e7   :  { %v1852_v11 = vadd.f32 %v1851_v47, %v1850_v24  ;;  %v1866_v17 = vadd.f32 %v1865_v63, %v1864_v10  ;;  %v1858_v12 = vrot.slane %v1857_v55, 4  ;;  %v1872_v19 = vrot.slane %v1871_v3, 4 }
 0x8e9   :  { %v1853_v6 = vrot.slane %v1852_v11, 2  ;;  %v1867_v21 = vrot.slane %v1866_v17, 2  ;;  %v1859_v22 = vadd.f32 %v1858_v12, %v1857_v55  ;;  %v1873_v27 = vadd.f32 %v1872_v19, %v1871_v3  ;;  %v3031_v3 = vld [vmem:[#allocation12 + $0x38] sm:$0x3f] }
 0x8eb   :  { %v1854_v31 = vadd.f32 %v1853_v6, %v1852_v11  ;;  %v1868_v7 = vadd.f32 %v1867_v21, %v1866_v17  ;;  %v1860_v20 = vrot.slane %v1859_v22, 2  ;;  %v1874_v23 = vrot.slane %v1873_v27, 2 }
 0x8ec   :  { %v1562_v11 = vrot.slane %v3031_v3, %v2948_v26 }
 0x8ed   :  { %v1855_v5 = vrot.slane %v1854_v31, 1  ;;  %v1869_v50 = vrot.slane %v1868_v7, 1  ;;  %v1861_v34 = vadd.f32 %v1860_v20, %v1859_v22  ;;  %v1875_v44 = vadd.f32 %v1874_v23, %v1873_v27 }
 0x8ef   :  { %v1856_v62 = vadd.f32 %v1855_v5, %v1854_v31  ;;  %v1870_v25 = vadd.f32 %v1869_v50, %v1868_v7  ;;  %v1862_v35 = vrot.slane %v1861_v34, 1  ;;  %v1876_v4 = vrot.slane %v1875_v44, 1 }
 0x8f1   :  { %v1906_v33 = vmul.f32 0.5, %v1856_v62  ;;  %v1908_v37 = vmul.f32 0.5, %v1870_v25  ;;  %v1863_v38 = vadd.f32 %v1862_v35, %v1861_v34  ;;  %v1877_v39 = vadd.f32 %v1876_v4, %v1875_v44 }
 0x8f2   :  { %v1774_v43 = vpop.f32.mrf.mxu1  ;;  %v1845_v40 = vpop.f32.mrf.mxu0 }
 0x8f3   :  { %v3001_v41 = vsub.f32 %v1633_v60, %v1906_v33  ;;  %v3003_v30 = vsub.f32 %v1704_v15, %v1908_v37  ;;  %v1907_v42 = vmul.f32 0.5, %v1863_v38  ;;  %v1909_v45 = vmul.f32 0.5, %v1877_v39 }
 0x8f4   :  { %v3005_v48 = vadd.f32 %v1774_v43, %v1550_v28  ;;  %v3007_v49 = vadd.f32 %v1845_v40, %v1558_v32  ;;  %v1776_v24 = vpop.f32.mrf.mxu1  ;;  %v1847_v7 = vpop.f32.mrf.mxu0 }
 0x8f5   :  { %v1922_v51 = vmul.f32 %v3001_v41, %v3001_v41  ;;  %v1924_v52 = vmul.f32 %v3003_v30, %v3003_v30  ;;  %v3017_v0 = vsub.f32 %v1635_v61, %v1907_v42  ;;  %v3019_v9 = vsub.f32 %v1706_v8, %v1909_v45 }
 0x8f6   :  { %v1878_v46 = vsel %vm833_vm10, %v3005_v48, 0.0  ;;  %v1892_v59 = vsel %vm833_vm10, %v3007_v49, 0.0  ;;  %v3036_v6 = vadd.f32 %v1776_v24, %v1554_v57  ;;  %v3041_v28 = vadd.f32 %v1847_v7, %v1562_v11 }
 0x8f7   :  { %v1930_v60 = vsel %vm833_vm10, %v1922_v51, 0.0  ;;  %v1944_v15 = vsel %vm833_vm10, %v1924_v52, 0.0  ;;  %v1879_v13 = vrot.slane %v1878_v46, 4  ;;  %v1893_v18 = vrot.slane %v1892_v59, 4 }
 0x8f8   :  { %v1931_v10 = vrot.slane %v1930_v60, 4  ;;  %v1945_v47 = vrot.slane %v1944_v15, 4  ;;  %v1923_v61 = vmul.f32 %v3017_v0, %v3017_v0  ;;  %v1925_v8 = vmul.f32 %v3019_v9, %v3019_v9 }
 0x8f9   :  { %v1880_v63 = vadd.f32 %v1879_v13, %v1878_v46  ;;  %v1894_v55 = vadd.f32 %v1893_v18, %v1892_v59  ;;  %v1885_v50 = vsel %vm833_vm10, %v3036_v6, 0.0  ;;  %v1899_v42 = vsel %vm833_vm10, %v3041_v28, 0.0 }
 0x8fa   :  { %v1932_v17 = vadd.f32 %v1931_v10, %v1930_v60  ;;  %v1946_v12 = vadd.f32 %v1945_v47, %v1944_v15  ;;  %v1937_v19 = vsel %vm833_vm10, %v1923_v61, 0.0  ;;  %v1951_v22 = vsel %vm833_vm10, %v1925_v8, 0.0 }
 0x8fb   :  { %v1938_v21 = vrot.slane %v1937_v19, 4  ;;  %v1881_v27 = vrot.slane %v1880_v63, 2  ;;  %v1895_v31 = vrot.slane %v1894_v55, 2  ;;  %v1952_v5 = vrot.slane %v1951_v22, 4 }
 0x8fc   :  { %v1933_v20 = vrot.slane %v1932_v17, 2  ;;  %v1947_v23 = vrot.slane %v1946_v12, 2  ;;  %v1886_v62 = vrot.slane %v1885_v50, 4  ;;  %v1900_v15 = vrot.slane %v1899_v42, 4 }
 0x8fd   :  { %v1939_v34 = vadd.f32 %v1938_v21, %v1937_v19  ;;  %v1882_v26 = vadd.f32 %v1881_v27, %v1880_v63  ;;  %v1896_v44 = vadd.f32 %v1895_v31, %v1894_v55  ;;  %v1953_v4 = vadd.f32 %v1952_v5, %v1951_v22 }
 0x8fe   :  { %v1934_v25 = vadd.f32 %v1933_v20, %v1932_v17  ;;  %v1948_v35 = vadd.f32 %v1947_v23, %v1946_v12  ;;  %v1887_v38 = vadd.f32 %v1886_v62, %v1885_v50  ;;  %v1901_v63 = vadd.f32 %v1900_v15, %v1899_v42 }
 0x8ff   :  { %v1940_v32 = vrot.slane %v1939_v34, 2  ;;  %v1883_v33 = vrot.slane %v1882_v26, 1  ;;  %v1897_v37 = vrot.slane %v1896_v44, 1  ;;  %v1954_v40 = vrot.slane %v1953_v4, 2 }
 0x900   :  { %v1935_v39 = vrot.slane %v1934_v25, 1  ;;  %v1949_v43 = vrot.slane %v1948_v35, 1  ;;  %v1888_v57 = vrot.slane %v1887_v38, 2  ;;  %v1902_v20 = vrot.slane %v1901_v63, 2 }
 0x901   :  { %v1941_v45 = vadd.f32 %v1940_v32, %v1939_v34  ;;  %v1884_v51 = vadd.f32 %v1883_v33, %v1882_v26  ;;  %v1898_v52 = vadd.f32 %v1897_v37, %v1896_v44  ;;  %v1955_v60 = vadd.f32 %v1954_v40, %v1953_v4 }
 0x902   :  { %v1936_v46 = vadd.f32 %v1935_v39, %v1934_v25  ;;  %v1950_v59 = vadd.f32 %v1949_v43, %v1948_v35  ;;  %v1889_v10 = vadd.f32 %v1888_v57, %v1887_v38  ;;  %v1903_v25 = vadd.f32 %v1902_v20, %v1901_v63 }
 0x903   :  { %v1942_v13 = vrot.slane %v1941_v45, 1  ;;  %v1910_v18 = vmul.f32 0.5, %v1884_v51  ;;  %v1912_v24 = vmul.f32 0.5, %v1898_v52  ;;  %v1956_v8 = vrot.slane %v1955_v60, 1 }
 0x904   :  { %v1986_v47 = vmul.f32 0.5, %v1936_v46  ;;  %v1988_v61 = vmul.f32 0.5, %v1950_v59  ;;  %v1890_v12 = vrot.slane %v1889_v10, 1  ;;  %v1904_v33 = vrot.slane %v1903_v25, 1 }
 0x905   :  { %v1943_v55 = vadd.f32 %v1942_v13, %v1941_v45  ;;  %v3046_v11 = vsub.f32 %v3005_v48, %v1910_v18  ;;  %v3049_v17 = vsub.f32 %v3007_v49, %v1912_v24  ;;  %v1957_v22 = vadd.f32 %v1956_v8, %v1955_v60 }
 0x906   :  { %v2034_v19 = vadd.f32 1e-05, %v1986_v47  ;;  %v2036_v21 = vadd.f32 1e-05, %v1988_v61  ;;  %v1891_v5 = vadd.f32 %v1890_v12, %v1889_v10  ;;  %v1905_v43 = vadd.f32 %v1904_v33, %v1903_v25 }
 0x907   :  { %v1987_v27 = vmul.f32 0.5, %v1943_v55  ;;  %v1926_v31 = vmul.f32 %v3046_v11, %v3046_v11  ;;  %v1928_v7 = vmul.f32 %v3049_v17, %v3049_v17  ;;  %v1989_v23 = vmul.f32 0.5, %v1957_v22 }
 0x908   :  { %2378 = vrsqrt.f32 %v2034_v19  ;;  %v1911_v62 = vmul.f32 0.5, %v1891_v5  ;;  %v1997_v40 = vrot.slane %v2973_v53, %v2954_v16  ;;  %v2005_v52 = vrot.slane %v2977_v56, %v2954_v16 }
 0x909   :  { %2380 = vrsqrt.f32 %v2036_v21  ;;  %v2035_v48 = vadd.f32 1e-05, %v1987_v27  ;;  %v1958_v49 = vsel %vm833_vm10, %v1926_v31, 0.0  ;;  %v1972_v50 = vsel %vm833_vm10, %v1928_v7, 0.0 }
 0x90a   :  { %v2037_v34 = vadd.f32 1e-05, %v1989_v23  ;;  %v1959_v26 = vrot.slane %v1958_v49, 4  ;;  %v1973_v44 = vrot.slane %v1972_v50, 4  ;;  %v3058_v32 = vsub.f32 %v3036_v6, %v1911_v62 }
 0x90b   :  { %2382 = vrsqrt.f32 %v2035_v48  ;;  %v1913_v6 = vmul.f32 0.5, %v1905_v43  ;;  %v2001_v46 = vrot.slane %v2981_v58, %v2954_v16  ;;  %v2061_v15 = vrot.slane %v2973_v53, %v2958_v1 }
 0x90c   :  { %2384 = vrsqrt.f32 %v2037_v34  ;;  %v1960_v35 = vadd.f32 %v1959_v26, %v1958_v49  ;;  %v1974_v4 = vadd.f32 %v1973_v44, %v1972_v50  ;;  %v1927_v39 = vmul.f32 %v3058_v32, %v3058_v32 }
 0x90d   :  { %v2009_v13 = vrot.slane %v2985_v2, %v2954_v16  ;;  %v3074_v24 = vsub.f32 %v3041_v28, %v1913_v6  ;;  %v2026_v10 = vmul.f32 %v1997_v40, %v3001_v41  ;;  %v2069_v47 = vrot.slane %v2977_v56, %v2958_v1 }
 0x90e   :  { %v1961_v37 = vrot.slane %v1960_v35, 2  ;;  %v1975_v38 = vrot.slane %v1974_v4, 2  ;;  %v1965_v51 = vsel %vm833_vm10, %v1927_v39, 0.0  ;;  %v2028_v55 = vmul.f32 %v2005_v52, %v3003_v30 }
 0x90f   :  { %v1966_v57 = vrot.slane %v1965_v51, 4  ;;  %v2065_v53 = vrot.slane %v2981_v58, %v2958_v1  ;;  %v1929_v19 = vmul.f32 %v3074_v24, %v3074_v24  ;;  %v2073_v41 = vrot.slane %v2985_v2, %v2958_v1 }
 0x910   :  { %v1962_v42 = vadd.f32 %v1961_v37, %v1960_v35  ;;  %v1976_v45 = vadd.f32 %v1975_v38, %v1974_v4  ;;  %v2027_v31 = vmul.f32 %v2001_v46, %v3017_v0  ;;  %v2029_v58 = vmul.f32 %v2009_v13, %v3019_v9 }
 0x911   :  { %v1967_v18 = vadd.f32 %v1966_v57, %v1965_v51  ;;  %v1979_v30 = vsel %vm833_vm10, %v1929_v19, 0.0  ;;  %v2013_v57 = vrot.slane %v2993_v29, %v2954_v16 }
 0x912   :  { %v1963_v59 = vrot.slane %v1962_v42, 1  ;;  %v1977_v60 = vrot.slane %v1976_v45, 1  ;;  %v1980_v48 = vrot.slane %v1979_v30, 4 }
 0x913   :  { %v1968_v12 = vrot.slane %v1967_v18, 2 }
 0x914   :  { %v1964_v61 = vadd.f32 %v1963_v59, %v1962_v42  ;;  %v1978_v8 = vadd.f32 %v1977_v60, %v1976_v45  ;;  %v1981_v37 = vadd.f32 %v1980_v48, %v1979_v30  ;;  %v2030_v59 = vmul.f32 %v2013_v57, %v3046_v11 }
 0x915   :  { %v2379_v63 = vpop.eup %2378  ;;  %v1969_v7 = vadd.f32 %v1968_v12, %v1967_v18 }
 0x916   :  { %v2381_v21 = vpop.eup %2380  ;;  %v2050_v28 = vmul.f32 %v2379_v63, %v2026_v10  ;;  %v1990_v22 = vmul.f32 0.5, %v1964_v61  ;;  %v1992_v27 = vmul.f32 0.5, %v1978_v8  ;;  %v1982_v42 = vrot.slane %v1981_v37, 2 }
 0x917   :  { %v2052_v56 = vmul.f32 %v2381_v21, %v2028_v55  ;;  %v1970_v26 = vrot.slane %v1969_v7, 1  ;;  %v2077_v10 = vrot.slane %v2993_v29, %v2958_v1  ;;  %v2017_v55 = vrot.slane %v3013_v14, %v2954_v16 }
 0x918   :  { %v2383_v20 = vpop.eup %2382  ;;  %v3088_v23 = vadd.f32 %v2061_v15, %v2050_v28  ;;  %v2038_v5 = vadd.f32 1e-05, %v1990_v22  ;;  %v2040_v2 = vadd.f32 1e-05, %v1992_v27  ;;  %v1983_v52 = vadd.f32 %v1982_v42, %v1981_v37 }
 0x919   :  { %v2385_v49 = vpop.eup %2384  ;;  %v3091_v50 = vadd.f32 %v2069_v47, %v2052_v56  ;;  %v2051_v34 = vmul.f32 %v2383_v20, %v2027_v31  ;;  %v1971_v33 = vadd.f32 %v1970_v26, %v1969_v7  ;;  %v2021_v15 = vrot.slane %v2997_v36, %v2954_v16 }
 0x91a   :  { %v2106_v44 = vmin.f32 %v3088_v23, 0.0  ;;  %v2053_v62 = vmul.f32 %v2385_v49, %v2029_v58  ;;  %2386 = vrsqrt.f32 %v2038_v5  ;;  %v1984_v6 = vrot.slane %v1983_v52, 1 }
 0x91b   :  { %v2108_v0 = vmin.f32 %v3091_v50, 0.0  ;;  %v2091_v25 = vadd.f32 %v2065_v53, %v2051_v34  ;;  %2388 = vrsqrt.f32 %v2040_v2  ;;  %v1991_v43 = vmul.f32 0.5, %v1971_v33 }
 0x91c   :  { %v2114_v35 = vmul.f32 1.442695, %v2106_v44  ;;  %v2093_v4 = vadd.f32 %v2073_v41, %v2053_v62  ;;  %v1985_v46 = vadd.f32 %v1984_v6, %v1983_v52  ;;  %v2032_v63 = vmul.f32 %v2021_v15, %v3049_v17 }
 0x91d   :  { %v2118_v9 = vmul.f32 1.442695, %v2108_v0  ;;  %v2107_v38 = vmin.f32 %v2091_v25, 0.0  ;;  %v2039_v51 = vadd.f32 1e-05, %v1991_v43  ;;  %v2085_v21 = vrot.slane %v2997_v36, %v2958_v1 }
 0x91e   :  { %2390 = vpow2.f32 %v2114_v35  ;;  %v2109_v39 = vmin.f32 %v2093_v4, 0.0  ;;  %v1993_v13 = vmul.f32 0.5, %v1985_v46  ;;  %v2081_v29 = vrot.slane %v3013_v14, %v2958_v1 }
 0x91f   :  { %2392 = vpow2.f32 %v2118_v9  ;;  %v2116_v40 = vmul.f32 1.442695, %v2107_v38  ;;  %vm2098_vm4 = vcmp.gt.f32.partialorder %v3088_v23, 0.0  ;;  %vm2100_vm5 = vcmp.gt.f32.partialorder %v3091_v50, 0.0 }
 0x920   :  { %v2120_v45 = vmul.f32 1.442695, %v2109_v39  ;;  %v2041_v47 = vadd.f32 1e-05, %v1993_v13  ;;  %v2031_v27 = vmul.f32 %v2017_v55, %v3058_v32  ;;  %vm2099_vm6 = vcmp.gt.f32.partialorder %v2091_v25, 0.0 }
 0x921   :  { %2394 = vpow2.f32 %v2116_v40  ;;  %vm2101_vm7 = vcmp.gt.f32.partialorder %v2093_v4, 0.0  ;;  %v2025_v2 = vrot.slane %v3031_v3, %v2954_v16 }
 0x922   :  { %2396 = vpow2.f32 %v2120_v45 }
 0x923   :  { %2398 = vrsqrt.f32 %v2039_v51  ;;  %v2033_v35 = vmul.f32 %v2025_v2, %v3074_v24 }
 0x924   :  { %2400 = vrsqrt.f32 %v2041_v47 }
 0x927   :  { %v2387_v60 = vpop.eup %2386 }
 0x928   :  { %v2054_v18 = vmul.f32 %v2387_v60, %v2030_v59  ;;  %v2389_v61 = vpop.eup %2388 }
 0x929   :  { %v2056_v19 = vmul.f32 %v2389_v61, %v2032_v63 }
 0x92a   :  { %v2094_v11 = vadd.f32 %v2077_v10, %v2054_v18 }
 0x92b   :  { %v2391_v8 = vpop.eup %2390  ;;  %v2096_v20 = vadd.f32 %v2085_v21, %v2056_v19 }
 0x92c   :  { %v2393_v53 = vpop.eup %2392  ;;  %v2236_v12 = vadd.f32 -1.0, %v2391_v8  ;;  %v2110_v7 = vmin.f32 %v2094_v11, 0.0  ;;  %vm2102_vm9 = vcmp.gt.f32.partialorder %v2094_v11, 0.0 }
 0x92d   :  { %v2238_v41 = vadd.f32 -1.0, %v2393_v53  ;;  %v2112_v62 = vmin.f32 %v2096_v20, 0.0  ;;  %vm2104_vm10 = vcmp.gt.f32.partialorder %v2096_v20, 0.0 }
 0x92e   :  { %v2395_v28 = vpop.eup %2394  ;;  %v2138_v36 = vsel %vm2098_vm4, %v3088_v23, %v2236_v12  ;;  %v2122_v26 = vmul.f32 1.442695, %v2110_v7 }
 0x92f   :  { %v2397_v22 = vpop.eup %2396  ;;  %v2237_v17 = vadd.f32 -1.0, %v2395_v28  ;;  %v2140_v14 = vsel %vm2100_vm5, %v3091_v50, %v2238_v41  ;;  %v2089_v50 = vrot.slane %v3031_v3, %v2958_v1  ;;  %v2126_v16 = vmul.f32 1.442695, %v2112_v62 }
 0x930   :  { %v2399_v56 = vpop.eup %2398  ;;  %v2239_v31 = vadd.f32 -1.0, %v2397_v22  ;;  %2402 = vpow2.f32 %v2122_v26 }
 0x931   :  { %v2139_v30 = vsel %vm2099_vm6, %v2091_v25, %v2237_v17  ;;  %v2055_v58 = vmul.f32 %v2399_v56, %v2031_v27 }
 0x932   :  { %v2154_v5 = vcombine.low %v2138_v36, %v2139_v30  ;;  %v2141_v48 = vsel %vm2101_vm7, %v2093_v4, %v2239_v31  ;;  %v2401_v4 = vpop.eup %2400 }
 0x933   :  { %v2155_v49 = vcombine.low %v2140_v14, %v2141_v48  ;;  %v2095_v34 = vadd.f32 %v2081_v29, %v2055_v58  ;;  %v2057_v33 = vmul.f32 %v2401_v4, %v2033_v35 }
 0x934   :  { %v2162_v32 = vrot.slane %v2154_v5, %v2913_v54 }
 0x935   :  { %v2169_v44 = vrot.slane %v2155_v49, %v2913_v54  ;;  %v2111_v0 = vmin.f32 %v2095_v34, 0.0  ;;  %v2097_v37 = vadd.f32 %v2089_v50, %v2057_v33  ;;  %vm2103_vm8 = vcmp.gt.f32.partialorder %v2095_v34, 0.0 }
 0x937   :  { %v2170_v23 = vcombine.low %v2162_v32, %v2169_v44  ;;  %v2124_v25 = vmul.f32 1.442695, %v2111_v0  ;;  %v2113_v9 = vmin.f32 %v2097_v37, 0.0  ;;  %vm2105_vm11 = vcmp.gt.f32.partialorder %v2097_v37, 0.0 }
 0x939   :  { %2190 = vst [vmem:[%s3140_s11] sm:$0xff] %v2170_v23  ;;  %2404 = vpow2.f32 %v2124_v25  ;;  %v2128_v38 = vmul.f32 1.442695, %v2113_v9 }
 0x93a   :  { %2406 = vpow2.f32 %v2126_v16 }
 0x93b   :  { %2408 = vpow2.f32 %v2128_v38 }
 0x93d   :  { %v2403_v39 = vpop.eup %2402 }
 0x93e   :  { %v2240_v40 = vadd.f32 -1.0, %v2403_v39 }
 0x940   :  { %v2142_v3 = vsel %vm2102_vm9, %v2094_v11, %v2240_v40 }
 0x946   :  { %v2405_v43 = vpop.eup %2404 }
 0x947   :  { %v2241_v24 = vadd.f32 -1.0, %v2405_v43  ;;  %v2407_v42 = vpop.eup %2406 }
 0x948   :  { %v2242_v45 = vadd.f32 -1.0, %v2407_v42  ;;  %v2409_v51 = vpop.eup %2408 }
 0x949   :  { %v2143_v1 = vsel %vm2103_vm8, %v2095_v34, %v2241_v24  ;;  %v2243_v57 = vadd.f32 -1.0, %v2409_v51 }
 0x94a   :  { %v2171_v52 = vcombine.low %v2142_v3, %v2143_v1  ;;  %v2144_v6 = vsel %vm2104_vm10, %v2096_v20, %v2242_v45 }
 0x94b   :  { %v2145_v46 = vsel %vm2105_vm11, %v2097_v37, %v2243_v57 }
 0x94c   :  { %v2179_v59 = vrot.slane %v2171_v52, %v2913_v54  ;;  %v2172_v60 = vcombine.low %v2144_v6, %v2145_v46 }
 0x94e   :  { %v2186_v15 = vrot.slane %v2172_v60, %v2913_v54 }
 0x950   :  { %v2187_v13 = vcombine.low %v2179_v59, %v2186_v15 }
 0x952   :  { %2191 = vst [vmem:[%s3140_s11 + $0x8] sm:$0xff] %v2187_v13 }
 0x953   :  { %2200 = vsyncpa [#allocation3], 1 }
 0x954   :  { %2201 = vsyncpa [#allocation5], 1 }
 0x955   :  { %2202 = vsyncpa [#allocation8], 1 }
 0x956   :  { %2203 = vsyncpa [#allocation11], 1 }

</bundles_post_ra>
